<compile_context>
chip_gen: v7x
topology: tpu7x:2x2x1
jax: 0.10.0
libtpu: 0.0.40
codegen_flags: <defaults>
</compile_context>

<pallas_src>
import jax
import jax.numpy as jnp
from jax.experimental import pallas as pl
from jax.experimental.pallas import tpu as pltpu

# ---------------- model config (matches the nn.Module __init__ args) ----------
NODE_IN = 8          # node_in_channels
EDGE_DIM = 4         # edge_feature_dim
HIDDEN = 32          # gnn_hidden_channels
NUM_LAYERS = 2       # num_gnn_layers
MLP_HIDDEN = 16      # mlp_hidden_channels
OUT = 3              # out_channels_final
GINE_EPS = 0.0       # eps (train_eps=False)
BN_EPS = 1e-5        # nn.BatchNorm1d default eps
FP = 128             # padded (lane-dense) feature dimension

_PARAMS_PER_LAYER = 10   # raw: We, be, W1, b1, W2, b2, bn_g, bn_b, bn_m, bn_v
_W_PER_LAYER = 2         # packed square weights per layer: W1, W2
_B_PER_LAYER = 5         # packed vectors per layer: be, b1, b2, bn_s, bn_t


# ------------------------------- kernel ---------------------------------------
def _gine_kernel(x_ref, ea_ref, src_ref, dst_ref, batch_ref,
                 Wea_ref, W_ref, b_ref, out_ref):
    x = x_ref[...]            # [N, FP]  fp32 (cols >= NODE_IN are zero)
    ea = ea_ref[...]          # [E, FP]  fp32 (cols >= EDGE_DIM are zero)
    src = src_ref[...]        # [E, 1]   int32
    dst = dst_ref[...]        # [1, E]   int32
    bidx = batch_ref[...]     # [1, N]   int32

    N = x.shape[0]
    E = ea.shape[0]
    NG = out_ref.shape[0]

    # One-hot graph-structure matrices built in-kernel (bf16 0/1 values are exact).
    G = (src == jax.lax.broadcasted_iota(jnp.int32, (E, N), 1)).astype(jnp.bfloat16)
    S = (dst == jax.lax.broadcasted_iota(jnp.int32, (N, E), 0)).astype(jnp.bfloat16)
    Pm = (bidx == jax.lax.broadcasted_iota(jnp.int32, (NG, N), 0)).astype(jnp.bfloat16)
    cnt = jnp.sum(Pm.astype(jnp.float32), axis=1, keepdims=True)     # [NG, 1]
    inv_cnt = 1.0 / jnp.maximum(cnt, 1.0)

    # Hoisted loop-invariant edge embedding: ea @ [We_0 | We_1 | ...] -> [E, L*FP]
    edge_emb_all = jnp.dot(ea.astype(jnp.bfloat16), Wea_ref[...],
                           preferred_element_type=jnp.float32)

    for l in range(NUM_LAYERS):
        W1 = W_ref[_W_PER_LAYER * l + 0]                      # [FP, FP] bf16
        W2 = W_ref[_W_PER_LAYER * l + 1]
        be = b_ref[pl.ds(_B_PER_LAYER * l + 0, 1), :]         # [1, FP]  fp32
        b1 = b_ref[pl.ds(_B_PER_LAYER * l + 1, 1), :]
        b2 = b_ref[pl.ds(_B_PER_LAYER * l + 2, 1), :]
        bn_s = b_ref[pl.ds(_B_PER_LAYER * l + 3, 1), :]
        bn_t = b_ref[pl.ds(_B_PER_LAYER * l + 4, 1), :]

        # message = relu(x[src] + (edge_attr @ We + be))
        edge_emb = edge_emb_all[:, l * FP:(l + 1) * FP] + be           # [E, FP]
        x_src = jnp.dot(G, x.astype(jnp.bfloat16),
                        preferred_element_type=jnp.float32)            # [E, FP]
        msg = jnp.maximum(x_src + edge_emb, 0.0)
        # scatter-add over destination nodes
        aggr = jnp.dot(S, msg.astype(jnp.bfloat16),
                       preferred_element_type=jnp.float32)             # [N, FP]

        # GINE update: nn(x + aggr)   (eps == 0 -> no (1+eps) multiply)
        if GINE_EPS == 0.0:
            h = x + aggr
        else:
            h = (1.0 + GINE_EPS) * x + aggr
        h = jnp.maximum(
            jnp.dot(h.astype(jnp.bfloat16), W1, preferred_element_type=jnp.float32)
            + b1, 0.0)
        h = jnp.maximum(
            jnp.dot(h.astype(jnp.bfloat16), W2, preferred_element_type=jnp.float32)
            + b2, 0.0)

        # BatchNorm1d (eval, pre-folded to scale/shift) + outer ReLU
        x = jnp.maximum(h * bn_s + bn_t, 0.0)

    # global mean pool
    pooled = jnp.dot(Pm, x.astype(jnp.bfloat16),
                     preferred_element_type=jnp.float32) * inv_cnt     # [NG, FP]

    # MLP classifier (Dropout = identity at inference)
    Wc1 = W_ref[_W_PER_LAYER * NUM_LAYERS + 0]
    Wc2 = W_ref[_W_PER_LAYER * NUM_LAYERS + 1]
    bc1 = b_ref[pl.ds(_B_PER_LAYER * NUM_LAYERS + 0, 1), :]
    bc2 = b_ref[pl.ds(_B_PER_LAYER * NUM_LAYERS + 1, 1), :]
    z = jnp.maximum(
        jnp.dot(pooled.astype(jnp.bfloat16), Wc1, preferred_element_type=jnp.float32)
        + bc1, 0.0)
    out_ref[...] = (
        jnp.dot(z.astype(jnp.bfloat16), Wc2, preferred_element_type=jnp.float32) + bc2)


# --------------------------- parameter handling --------------------------------
def make_params(key):
    """Deterministic synthetic raw parameters (shapes dictated by the module)."""
    params = []
    in_dim = NODE_IN
    for _ in range(NUM_LAYERS):
        key, k0, k1, k2, k3, k4, k5 = jax.random.split(key, 7)
        We = 0.1 * jax.random.normal(k0, (EDGE_DIM, in_dim), jnp.float32)
        be = 0.1 * jax.random.normal(k1, (1, in_dim), jnp.float32)
        W1 = 0.1 * jax.random.normal(k2, (in_dim, HIDDEN), jnp.float32)
        b1 = 0.1 * jax.random.normal(k3, (1, HIDDEN), jnp.float32)
        W2 = 0.1 * jax.random.normal(k4, (HIDDEN, HIDDEN), jnp.float32)
        b2 = 0.1 * jax.random.normal(k5, (1, HIDDEN), jnp.float32)
        bn_g = jnp.ones((1, HIDDEN), jnp.float32)
        bn_b = jnp.zeros((1, HIDDEN), jnp.float32)
        bn_m = jnp.zeros((1, HIDDEN), jnp.float32)
        bn_v = jnp.ones((1, HIDDEN), jnp.float32)
        params += [We, be, W1, b1, W2, b2, bn_g, bn_b, bn_m, bn_v]
        in_dim = HIDDEN
    key, k0, k1, k2, k3 = jax.random.split(key, 5)
    Wc1 = 0.1 * jax.random.normal(k0, (HIDDEN, MLP_HIDDEN), jnp.float32)
    bc1 = 0.1 * jax.random.normal(k1, (1, MLP_HIDDEN), jnp.float32)
    Wc2 = 0.1 * jax.random.normal(k2, (MLP_HIDDEN, OUT), jnp.float32)
    bc2 = 0.1 * jax.random.normal(k3, (1, OUT), jnp.float32)
    params += [Wc1, bc1, Wc2, bc2]
    return params


def _pad2(a, rows, cols):
    out = jnp.zeros((rows, cols), jnp.float32)
    return out.at[: a.shape[0], : a.shape[1]].set(a.astype(jnp.float32))


def prep_params(raw_params):
    """Fold BN to scale/shift, zero-pad to FP=128, pack into bf16/fp32 stacks."""
    We_blocks, Ws, bs = [], [], []
    idx = 0
    for _ in range(NUM_LAYERS):
        (We, be, W1, b1, W2, b2,
         bn_g, bn_b, bn_m, bn_v) = raw_params[idx: idx + _PARAMS_PER_LAYER]
        idx += _PARAMS_PER_LAYER
        bn_s = bn_g * jax.lax.rsqrt(bn_v + BN_EPS)          # eval-mode BN fold
        bn_t = bn_b - bn_m * bn_s
        We_blocks.append(_pad2(We, FP, FP))
        Ws += [_pad2(W1, FP, FP), _pad2(W2, FP, FP)]
        bs += [_pad2(be, 1, FP), _pad2(b1, 1, FP), _pad2(b2, 1, FP),
               _pad2(bn_s, 1, FP), _pad2(bn_t, 1, FP)]
    Wc1, bc1, Wc2, bc2 = raw_params[idx: idx + 4]
    Ws += [_pad2(Wc1, FP, FP), _pad2(Wc2, FP, FP)]
    bs += [_pad2(bc1, 1, FP), _pad2(bc2, 1, FP)]
    Wea = jnp.concatenate(We_blocks, axis=1).astype(jnp.bfloat16)   # [FP, L*FP]
    W_stack = jnp.stack(Ws, axis=0).astype(jnp.bfloat16)            # [2L+2, FP, FP]
    b_stack = jnp.concatenate(bs, axis=0)                           # [5L+2, FP] fp32
    return Wea, W_stack, b_stack


# ------------------------------- wrapper ---------------------------------------
def gine_forward(x, edge_index, edge_attr, batch, Wea, W_stack, b_stack, num_graphs):
    """Batched forward.  x:[B,N,NODE_IN] ei:[B,2,E] ea:[B,E,EDGE_DIM] batch:[B,N]."""
    B, N, _ = x.shape
    E = edge_attr.shape[1]
    xp = jnp.zeros((B, N, FP), jnp.float32).at[:, :, : x.shape[2]].set(
        x.astype(jnp.float32))
    eap = jnp.zeros((B, E, FP), jnp.float32).at[:, :, : edge_attr.shape[2]].set(
        edge_attr.astype(jnp.float32))
    src = edge_index[:, 0, :].astype(jnp.int32).reshape(B, E, 1)
    dst = edge_index[:, 1, :].astype(jnp.int32).reshape(B, 1, E)
    bidx = batch.astype(jnp.int32).reshape(B, 1, N)

    n_w = _W_PER_LAYER * NUM_LAYERS + 2
    n_b = _B_PER_LAYER * NUM_LAYERS + 2

    out_pad = pl.pallas_call(
        _gine_kernel,
        out_shape=jax.ShapeDtypeStruct((B, num_graphs, FP), jnp.float32),
        grid=(B,),
        in_specs=[
            # per-graph-batch inputs: one block per grid step (auto double-buffered)
            pl.BlockSpec((None, N, FP), lambda b: (b, 0, 0)),
            pl.BlockSpec((None, E, FP), lambda b: (b, 0, 0)),
            pl.BlockSpec((None, E, 1), lambda b: (b, 0, 0)),
            pl.BlockSpec((None, 1, E), lambda b: (b, 0, 0)),
            pl.BlockSpec((None, 1, N), lambda b: (b, 0, 0)),
            # weights: constant index_map -> DMA'd once, VMEM-resident across grid
            pl.BlockSpec((FP, NUM_LAYERS * FP), lambda b: (0, 0)),
            pl.BlockSpec((n_w, FP, FP), lambda b: (0, 0, 0)),
            pl.BlockSpec((n_b, FP), lambda b: (0, 0)),
        ],
        out_specs=pl.BlockSpec((None, num_graphs, FP), lambda b: (b, 0, 0)),
        compiler_params=pltpu.CompilerParams(
            dimension_semantics=("parallel",),          # v7x: shard batch across TCs
            vmem_limit_bytes=32 * 1024 * 1024,
        ),
    )(xp, eap, src, dst, bidx, Wea, W_stack, b_stack)
    return out_pad[:, :, :OUT]


# --------------------------- pure-JAX reference ---------------------------------
def gine_forward_ref_single(x, edge_index, edge_attr, batch, raw_params, num_graphs):
    x = x.astype(jnp.float32)
    ea = edge_attr.astype(jnp.float32)
    src, dst = edge_index[0], edge_index[1]
    idx = 0
    for _ in range(NUM_LAYERS):
        (We, be, W1, b1, W2, b2,
         bn_g, bn_b, bn_m, bn_v) = raw_params[idx: idx + _PARAMS_PER_LAYER]
        idx += _PARAMS_PER_LAYER
        msg = jnp.maximum(x[src] + (ea @ We + be), 0.0)
        aggr = jax.ops.segment_sum(msg, dst, num_segments=x.shape[0])
        h = (1.0 + GINE_EPS) * x + aggr
        h = jnp.maximum(h @ W1 + b1, 0.0)
        h = jnp.maximum(h @ W2 + b2, 0.0)
        h = (h - bn_m) * jax.lax.rsqrt(bn_v + BN_EPS) * bn_g + bn_b
        x = jnp.maximum(h, 0.0)
    sums = jax.ops.segment_sum(x, batch, num_segments=num_graphs)
    cnts = jnp.maximum(jax.ops.segment_sum(jnp.ones_like(batch, jnp.float32), batch,
                                           num_segments=num_graphs), 1.0)
    pooled = sums / cnts[:, None]
    Wc1, bc1, Wc2, bc2 = raw_params[idx: idx + 4]
    z = jnp.maximum(pooled @ Wc1 + bc1, 0.0)
    return z @ Wc2 + bc2


# ---------------------------------- demo ----------------------------------------
if __name__ == "__main__":
    key = jax.random.PRNGKey(0)
    k_x, k_ea, k_ei, k_p = jax.random.split(key, 4)

    B = 4             # graph-batches (grid steps / "parallel" axis)
    N = 32            # nodes per graph-batch
    E = 64            # edges per graph-batch
    NUM_GRAPHS = 2    # graphs per graph-batch

    x = jax.random.normal(k_x, (B, N, NODE_IN), jnp.float32)
    edge_attr = jax.random.normal(k_ea, (B, E, EDGE_DIM), jnp.float32)
    edge_index = jax.random.randint(k_ei, (B, 2, E), 0, N, dtype=jnp.int32)
    batch_vec = jnp.concatenate([jnp.zeros((N // 2,), jnp.int32),
                                 jnp.ones((N - N // 2,), jnp.int32)])
    batch = jnp.broadcast_to(batch_vec, (B, N))

    raw_params = make_params(k_p)
    Wea, W_stack, b_stack = prep_params(raw_params)

    logits = gine_forward(x, edge_index, edge_attr, batch, Wea, W_stack, b_stack,
                          NUM_GRAPHS)
    logits = jax.block_until_ready(logits)

    ref = jnp.stack([
        gine_forward_ref_single(x[b], edge_index[b], edge_attr[b], batch[b],
                                raw_params, NUM_GRAPHS)
        for b in range(B)
    ])
    ref = jax.block_until_ready(ref)

    assert logits.shape == (B, NUM_GRAPHS, OUT)
    # bf16 MXU operands with fp32 accumulation / fp32 elementwise -> ~1e-3 abs error
    assert jnp.allclose(logits, ref, rtol=2e-2, atol=2e-2)

    print("KERNEL_OK")
</pallas_src>

<mosaic_0001>
module attributes {stable_mosaic.version = 11 : i64} {
  func.func @_gine_kernel(%arg0: i32, %arg1: memref<1x32x128xf32, #tpu.memory_space<vmem>>, %arg2: memref<1x64x128xf32, #tpu.memory_space<vmem>>, %arg3: memref<1x64x1xi32, #tpu.memory_space<vmem>>, %arg4: memref<1x1x64xi32, #tpu.memory_space<vmem>>, %arg5: memref<1x1x32xi32, #tpu.memory_space<vmem>>, %arg6: memref<128x256xbf16, #tpu.memory_space<vmem>>, %arg7: memref<6x128x128xbf16, #tpu.memory_space<vmem>>, %arg8: memref<12x128xf32, #tpu.memory_space<vmem>>, %arg9: memref<1x2x128xf32, #tpu.memory_space<vmem>>) attributes {dimension_semantics = [#tpu.dimension_semantics<parallel>], iteration_bounds = array<i64: 4>, scalar_prefetch = 0 : i64, scratch_operands = 0 : i64, tpu.core_type = #tpu.core_type<tc>, window_params = [{transform_indices = @transform_0, window_bounds = array<i64: 1, 32, 128>}, {transform_indices = @transform_1, window_bounds = array<i64: 1, 64, 128>}, {transform_indices = @transform_2, window_bounds = array<i64: 1, 64, 1>}, {transform_indices = @transform_3, window_bounds = array<i64: 1, 1, 64>}, {transform_indices = @transform_4, window_bounds = array<i64: 1, 1, 32>}, {pipeline_mode = #tpu.pipeline_mode<synchronous>, transform_indices = @transform_5, window_bounds = array<i64: 128, 256>}, {pipeline_mode = #tpu.pipeline_mode<synchronous>, transform_indices = @transform_6, window_bounds = array<i64: 6, 128, 128>}, {pipeline_mode = #tpu.pipeline_mode<synchronous>, transform_indices = @transform_7, window_bounds = array<i64: 12, 128>}, {transform_indices = @transform_8, window_bounds = array<i64: 1, 2, 128>}]} {
    %c0 = arith.constant 0 : index
    %c0_0 = arith.constant 0 : index
    %c0_1 = arith.constant 0 : index
    %0 = vector.load %arg1[%c0, %c0_0, %c0_1] : memref<1x32x128xf32, #tpu.memory_space<vmem>>, vector<1x32x128xf32>
    %1 = vector.shape_cast %0 : vector<1x32x128xf32> to vector<32x128xf32>
    %c0_2 = arith.constant 0 : index
    %c0_3 = arith.constant 0 : index
    %c0_4 = arith.constant 0 : index
    %2 = vector.load %arg2[%c0_2, %c0_3, %c0_4] : memref<1x64x128xf32, #tpu.memory_space<vmem>>, vector<1x64x128xf32>
    %3 = vector.shape_cast %2 : vector<1x64x128xf32> to vector<64x128xf32>
    %c0_5 = arith.constant 0 : index
    %c0_6 = arith.constant 0 : index
    %c0_7 = arith.constant 0 : index
    %4 = vector.load %arg3[%c0_5, %c0_6, %c0_7] : memref<1x64x1xi32, #tpu.memory_space<vmem>>, vector<1x64x1xi32>
    %5 = vector.shape_cast %4 : vector<1x64x1xi32> to vector<64x1xi32>
    %c0_8 = arith.constant 0 : index
    %c0_9 = arith.constant 0 : index
    %c0_10 = arith.constant 0 : index
    %6 = vector.load %arg4[%c0_8, %c0_9, %c0_10] : memref<1x1x64xi32, #tpu.memory_space<vmem>>, vector<1x1x64xi32>
    %7 = vector.shape_cast %6 : vector<1x1x64xi32> to vector<1x64xi32>
    %c0_11 = arith.constant 0 : index
    %c0_12 = arith.constant 0 : index
    %c0_13 = arith.constant 0 : index
    %8 = vector.load %arg5[%c0_11, %c0_12, %c0_13] : memref<1x1x32xi32, #tpu.memory_space<vmem>>, vector<1x1x32xi32>
    %9 = vector.shape_cast %8 : vector<1x1x32xi32> to vector<1x32xi32>
    %10 = tpu.iota {dimensions = array<i32: 1>} : vector<64x32xi32>
    %11 = vector.broadcast %5 : vector<64x1xi32> to vector<64x32xi32>
    %12 = arith.cmpi eq, %11, %10 : vector<64x32xi32>
    %13 = arith.extui %12 : vector<64x32xi1> to vector<64x32xi32>
    %14 = arith.sitofp %13 : vector<64x32xi32> to vector<64x32xf32>
    %15 = arith.truncf %14 : vector<64x32xf32> to vector<64x32xbf16>
    %16 = tpu.iota {dimensions = array<i32: 0>} : vector<32x64xi32>
    %17 = vector.broadcast %7 : vector<1x64xi32> to vector<32x64xi32>
    %18 = arith.cmpi eq, %17, %16 : vector<32x64xi32>
    %19 = arith.extui %18 : vector<32x64xi1> to vector<32x64xi32>
    %20 = arith.sitofp %19 : vector<32x64xi32> to vector<32x64xf32>
    %21 = arith.truncf %20 : vector<32x64xf32> to vector<32x64xbf16>
    %22 = tpu.iota {dimensions = array<i32: 0>} : vector<2x32xi32>
    %23 = vector.broadcast %9 : vector<1x32xi32> to vector<2x32xi32>
    %24 = arith.cmpi eq, %23, %22 : vector<2x32xi32>
    %25 = arith.extui %24 : vector<2x32xi1> to vector<2x32xi32>
    %26 = arith.sitofp %25 : vector<2x32xi32> to vector<2x32xf32>
    %27 = arith.truncf %26 : vector<2x32xf32> to vector<2x32xbf16>
    %28 = arith.extf %27 : vector<2x32xbf16> to vector<2x32xf32>
    %cst = arith.constant dense<0.000000e+00> : vector<2xf32>
    %29 = vector.multi_reduction <add>, %28, %cst [1] : vector<2x32xf32> to vector<2xf32>
    %30 = vector.shape_cast %29 : vector<2xf32> to vector<2x1xf32>
    %cst_14 = arith.constant 1.000000e+00 : f32
    %31 = vector.broadcast %cst_14 : f32 to vector<2x1xf32>
    %32 = arith.maximumf %30, %31 : vector<2x1xf32>
    %cst_15 = arith.constant 1.000000e+00 : f32
    %33 = vector.broadcast %cst_15 : f32 to vector<2x1xf32>
    %34 = arith.divf %33, %32 : vector<2x1xf32>
    %35 = arith.truncf %3 : vector<64x128xf32> to vector<64x128xbf16>
    %c0_16 = arith.constant 0 : index
    %c0_17 = arith.constant 0 : index
    %36 = vector.load %arg6[%c0_16, %c0_17] : memref<128x256xbf16, #tpu.memory_space<vmem>>, vector<128x256xbf16>
    %cst_18 = arith.constant dense<0.000000e+00> : vector<64x256xf32>
    %37 = tpu.matmul %35, %36, %cst_18 {dimension_numbers = #tpu.dot_dimension_numbers<[1], [0], [0], [1], [0, 0, 1, 1], [], []>} : vector<64x128xbf16>, vector<128x256xbf16>, vector<64x256xf32> -> vector<64x256xf32>
    %c0_19 = arith.constant 0 : index
    %c0_20 = arith.constant 0 : index
    %c0_21 = arith.constant 0 : index
    %38 = vector.load %arg7[%c0_19, %c0_20, %c0_21] : memref<6x128x128xbf16, #tpu.memory_space<vmem>>, vector<1x128x128xbf16>
    %39 = vector.shape_cast %38 : vector<1x128x128xbf16> to vector<128x128xbf16>
    %c1 = arith.constant 1 : index
    %c0_22 = arith.constant 0 : index
    %c0_23 = arith.constant 0 : index
    %40 = vector.load %arg7[%c1, %c0_22, %c0_23] : memref<6x128x128xbf16, #tpu.memory_space<vmem>>, vector<1x128x128xbf16>
    %41 = vector.shape_cast %40 : vector<1x128x128xbf16> to vector<128x128xbf16>
    %c0_24 = arith.constant 0 : index
    %c0_25 = arith.constant 0 : index
    %42 = vector.load %arg8[%c0_24, %c0_25] : memref<12x128xf32, #tpu.memory_space<vmem>>, vector<1x128xf32>
    %c1_26 = arith.constant 1 : index
    %c0_27 = arith.constant 0 : index
    %43 = vector.load %arg8[%c1_26, %c0_27] : memref<12x128xf32, #tpu.memory_space<vmem>>, vector<1x128xf32>
    %c2 = arith.constant 2 : index
    %c0_28 = arith.constant 0 : index
    %44 = vector.load %arg8[%c2, %c0_28] : memref<12x128xf32, #tpu.memory_space<vmem>>, vector<1x128xf32>
    %c3 = arith.constant 3 : index
    %c0_29 = arith.constant 0 : index
    %45 = vector.load %arg8[%c3, %c0_29] : memref<12x128xf32, #tpu.memory_space<vmem>>, vector<1x128xf32>
    %c4 = arith.constant 4 : index
    %c0_30 = arith.constant 0 : index
    %46 = vector.load %arg8[%c4, %c0_30] : memref<12x128xf32, #tpu.memory_space<vmem>>, vector<1x128xf32>
    %47 = vector.extract_strided_slice %37 {offsets = [0, 0], sizes = [64, 128], strides = [1, 1]} : vector<64x256xf32> to vector<64x128xf32>
    %48 = vector.broadcast %42 : vector<1x128xf32> to vector<64x128xf32>
    %49 = arith.addf %47, %48 : vector<64x128xf32>
    %50 = arith.truncf %1 : vector<32x128xf32> to vector<32x128xbf16>
    %cst_31 = arith.constant dense<0.000000e+00> : vector<64x128xf32>
    %51 = tpu.matmul %15, %50, %cst_31 {dimension_numbers = #tpu.dot_dimension_numbers<[1], [0], [0], [1], [0, 0, 1, 1], [], []>} : vector<64x32xbf16>, vector<32x128xbf16>, vector<64x128xf32> -> vector<64x128xf32>
    %52 = arith.addf %51, %49 : vector<64x128xf32>
    %cst_32 = arith.constant 0.000000e+00 : f32
    %53 = vector.broadcast %cst_32 : f32 to vector<64x128xf32>
    %54 = arith.maximumf %52, %53 : vector<64x128xf32>
    %55 = arith.truncf %54 : vector<64x128xf32> to vector<64x128xbf16>
    %cst_33 = arith.constant dense<0.000000e+00> : vector<32x128xf32>
    %56 = tpu.matmul %21, %55, %cst_33 {dimension_numbers = #tpu.dot_dimension_numbers<[1], [0], [0], [1], [0, 0, 1, 1], [], []>} : vector<32x64xbf16>, vector<64x128xbf16>, vector<32x128xf32> -> vector<32x128xf32>
    %57 = arith.addf %1, %56 : vector<32x128xf32>
    %58 = arith.truncf %57 : vector<32x128xf32> to vector<32x128xbf16>
    %cst_34 = arith.constant dense<0.000000e+00> : vector<32x128xf32>
    %59 = tpu.matmul %58, %39, %cst_34 {dimension_numbers = #tpu.dot_dimension_numbers<[1], [0], [0], [1], [0, 0, 1, 1], [], []>} : vector<32x128xbf16>, vector<128x128xbf16>, vector<32x128xf32> -> vector<32x128xf32>
    %60 = vector.broadcast %43 : vector<1x128xf32> to vector<32x128xf32>
    %61 = arith.addf %59, %60 : vector<32x128xf32>
    %cst_35 = arith.constant 0.000000e+00 : f32
    %62 = vector.broadcast %cst_35 : f32 to vector<32x128xf32>
    %63 = arith.maximumf %61, %62 : vector<32x128xf32>
    %64 = arith.truncf %63 : vector<32x128xf32> to vector<32x128xbf16>
    %cst_36 = arith.constant dense<0.000000e+00> : vector<32x128xf32>
    %65 = tpu.matmul %64, %41, %cst_36 {dimension_numbers = #tpu.dot_dimension_numbers<[1], [0], [0], [1], [0, 0, 1, 1], [], []>} : vector<32x128xbf16>, vector<128x128xbf16>, vector<32x128xf32> -> vector<32x128xf32>
    %66 = vector.broadcast %44 : vector<1x128xf32> to vector<32x128xf32>
    %67 = arith.addf %65, %66 : vector<32x128xf32>
    %cst_37 = arith.constant 0.000000e+00 : f32
    %68 = vector.broadcast %cst_37 : f32 to vector<32x128xf32>
    %69 = arith.maximumf %67, %68 : vector<32x128xf32>
    %70 = vector.broadcast %45 : vector<1x128xf32> to vector<32x128xf32>
    %71 = arith.mulf %69, %70 : vector<32x128xf32>
    %72 = vector.broadcast %46 : vector<1x128xf32> to vector<32x128xf32>
    %73 = arith.addf %71, %72 : vector<32x128xf32>
    %cst_38 = arith.constant 0.000000e+00 : f32
    %74 = vector.broadcast %cst_38 : f32 to vector<32x128xf32>
    %75 = arith.maximumf %73, %74 : vector<32x128xf32>
    %c2_39 = arith.constant 2 : index
    %c0_40 = arith.constant 0 : index
    %c0_41 = arith.constant 0 : index
    %76 = vector.load %arg7[%c2_39, %c0_40, %c0_41] : memref<6x128x128xbf16, #tpu.memory_space<vmem>>, vector<1x128x128xbf16>
    %77 = vector.shape_cast %76 : vector<1x128x128xbf16> to vector<128x128xbf16>
    %c3_42 = arith.constant 3 : index
    %c0_43 = arith.constant 0 : index
    %c0_44 = arith.constant 0 : index
    %78 = vector.load %arg7[%c3_42, %c0_43, %c0_44] : memref<6x128x128xbf16, #tpu.memory_space<vmem>>, vector<1x128x128xbf16>
    %79 = vector.shape_cast %78 : vector<1x128x128xbf16> to vector<128x128xbf16>
    %c5 = arith.constant 5 : index
    %c0_45 = arith.constant 0 : index
    %80 = vector.load %arg8[%c5, %c0_45] : memref<12x128xf32, #tpu.memory_space<vmem>>, vector<1x128xf32>
    %c6 = arith.constant 6 : index
    %c0_46 = arith.constant 0 : index
    %81 = vector.load %arg8[%c6, %c0_46] : memref<12x128xf32, #tpu.memory_space<vmem>>, vector<1x128xf32>
    %c7 = arith.constant 7 : index
    %c0_47 = arith.constant 0 : index
    %82 = vector.load %arg8[%c7, %c0_47] : memref<12x128xf32, #tpu.memory_space<vmem>>, vector<1x128xf32>
    %c8 = arith.constant 8 : index
    %c0_48 = arith.constant 0 : index
    %83 = vector.load %arg8[%c8, %c0_48] : memref<12x128xf32, #tpu.memory_space<vmem>>, vector<1x128xf32>
    %c9 = arith.constant 9 : index
    %c0_49 = arith.constant 0 : index
    %84 = vector.load %arg8[%c9, %c0_49] : memref<12x128xf32, #tpu.memory_space<vmem>>, vector<1x128xf32>
    %85 = vector.extract_strided_slice %37 {offsets = [0, 128], sizes = [64, 128], strides = [1, 1]} : vector<64x256xf32> to vector<64x128xf32>
    %86 = vector.broadcast %80 : vector<1x128xf32> to vector<64x128xf32>
    %87 = arith.addf %85, %86 : vector<64x128xf32>
    %88 = arith.truncf %75 : vector<32x128xf32> to vector<32x128xbf16>
    %cst_50 = arith.constant dense<0.000000e+00> : vector<64x128xf32>
    %89 = tpu.matmul %15, %88, %cst_50 {dimension_numbers = #tpu.dot_dimension_numbers<[1], [0], [0], [1], [0, 0, 1, 1], [], []>} : vector<64x32xbf16>, vector<32x128xbf16>, vector<64x128xf32> -> vector<64x128xf32>
    %90 = arith.addf %89, %87 : vector<64x128xf32>
    %cst_51 = arith.constant 0.000000e+00 : f32
    %91 = vector.broadcast %cst_51 : f32 to vector<64x128xf32>
    %92 = arith.maximumf %90, %91 : vector<64x128xf32>
    %93 = arith.truncf %92 : vector<64x128xf32> to vector<64x128xbf16>
    %cst_52 = arith.constant dense<0.000000e+00> : vector<32x128xf32>
    %94 = tpu.matmul %21, %93, %cst_52 {dimension_numbers = #tpu.dot_dimension_numbers<[1], [0], [0], [1], [0, 0, 1, 1], [], []>} : vector<32x64xbf16>, vector<64x128xbf16>, vector<32x128xf32> -> vector<32x128xf32>
    %95 = arith.addf %75, %94 : vector<32x128xf32>
    %96 = arith.truncf %95 : vector<32x128xf32> to vector<32x128xbf16>
    %cst_53 = arith.constant dense<0.000000e+00> : vector<32x128xf32>
    %97 = tpu.matmul %96, %77, %cst_53 {dimension_numbers = #tpu.dot_dimension_numbers<[1], [0], [0], [1], [0, 0, 1, 1], [], []>} : vector<32x128xbf16>, vector<128x128xbf16>, vector<32x128xf32> -> vector<32x128xf32>
    %98 = vector.broadcast %81 : vector<1x128xf32> to vector<32x128xf32>
    %99 = arith.addf %97, %98 : vector<32x128xf32>
    %cst_54 = arith.constant 0.000000e+00 : f32
    %100 = vector.broadcast %cst_54 : f32 to vector<32x128xf32>
    %101 = arith.maximumf %99, %100 : vector<32x128xf32>
    %102 = arith.truncf %101 : vector<32x128xf32> to vector<32x128xbf16>
    %cst_55 = arith.constant dense<0.000000e+00> : vector<32x128xf32>
    %103 = tpu.matmul %102, %79, %cst_55 {dimension_numbers = #tpu.dot_dimension_numbers<[1], [0], [0], [1], [0, 0, 1, 1], [], []>} : vector<32x128xbf16>, vector<128x128xbf16>, vector<32x128xf32> -> vector<32x128xf32>
    %104 = vector.broadcast %82 : vector<1x128xf32> to vector<32x128xf32>
    %105 = arith.addf %103, %104 : vector<32x128xf32>
    %cst_56 = arith.constant 0.000000e+00 : f32
    %106 = vector.broadcast %cst_56 : f32 to vector<32x128xf32>
    %107 = arith.maximumf %105, %106 : vector<32x128xf32>
    %108 = vector.broadcast %83 : vector<1x128xf32> to vector<32x128xf32>
    %109 = arith.mulf %107, %108 : vector<32x128xf32>
    %110 = vector.broadcast %84 : vector<1x128xf32> to vector<32x128xf32>
    %111 = arith.addf %109, %110 : vector<32x128xf32>
    %cst_57 = arith.constant 0.000000e+00 : f32
    %112 = vector.broadcast %cst_57 : f32 to vector<32x128xf32>
    %113 = arith.maximumf %111, %112 : vector<32x128xf32>
    %114 = arith.truncf %113 : vector<32x128xf32> to vector<32x128xbf16>
    %cst_58 = arith.constant dense<0.000000e+00> : vector<2x128xf32>
    %115 = tpu.matmul %27, %114, %cst_58 {dimension_numbers = #tpu.dot_dimension_numbers<[1], [0], [0], [1], [0, 0, 1, 1], [], []>} : vector<2x32xbf16>, vector<32x128xbf16>, vector<2x128xf32> -> vector<2x128xf32>
    %116 = vector.broadcast %34 : vector<2x1xf32> to vector<2x128xf32>
    %117 = arith.mulf %115, %116 : vector<2x128xf32>
    %c4_59 = arith.constant 4 : index
    %c0_60 = arith.constant 0 : index
    %c0_61 = arith.constant 0 : index
    %118 = vector.load %arg7[%c4_59, %c0_60, %c0_61] : memref<6x128x128xbf16, #tpu.memory_space<vmem>>, vector<1x128x128xbf16>
    %119 = vector.shape_cast %118 : vector<1x128x128xbf16> to vector<128x128xbf16>
    %c5_62 = arith.constant 5 : index
    %c0_63 = arith.constant 0 : index
    %c0_64 = arith.constant 0 : index
    %120 = vector.load %arg7[%c5_62, %c0_63, %c0_64] : memref<6x128x128xbf16, #tpu.memory_space<vmem>>, vector<1x128x128xbf16>
    %121 = vector.shape_cast %120 : vector<1x128x128xbf16> to vector<128x128xbf16>
    %c10 = arith.constant 10 : index
    %c0_65 = arith.constant 0 : index
    %122 = vector.load %arg8[%c10, %c0_65] : memref<12x128xf32, #tpu.memory_space<vmem>>, vector<1x128xf32>
    %c11 = arith.constant 11 : index
    %c0_66 = arith.constant 0 : index
    %123 = vector.load %arg8[%c11, %c0_66] : memref<12x128xf32, #tpu.memory_space<vmem>>, vector<1x128xf32>
    %124 = arith.truncf %117 : vector<2x128xf32> to vector<2x128xbf16>
    %cst_67 = arith.constant dense<0.000000e+00> : vector<2x128xf32>
    %125 = tpu.matmul %124, %119, %cst_67 {dimension_numbers = #tpu.dot_dimension_numbers<[1], [0], [0], [1], [0, 0, 1, 1], [], []>} : vector<2x128xbf16>, vector<128x128xbf16>, vector<2x128xf32> -> vector<2x128xf32>
    %126 = vector.broadcast %122 : vector<1x128xf32> to vector<2x128xf32>
    %127 = arith.addf %125, %126 : vector<2x128xf32>
    %cst_68 = arith.constant 0.000000e+00 : f32
    %128 = vector.broadcast %cst_68 : f32 to vector<2x128xf32>
    %129 = arith.maximumf %127, %128 : vector<2x128xf32>
    %130 = arith.truncf %129 : vector<2x128xf32> to vector<2x128xbf16>
    %cst_69 = arith.constant dense<0.000000e+00> : vector<2x128xf32>
    %131 = tpu.matmul %130, %121, %cst_69 {dimension_numbers = #tpu.dot_dimension_numbers<[1], [0], [0], [1], [0, 0, 1, 1], [], []>} : vector<2x128xbf16>, vector<128x128xbf16>, vector<2x128xf32> -> vector<2x128xf32>
    %132 = vector.broadcast %123 : vector<1x128xf32> to vector<2x128xf32>
    %133 = arith.addf %131, %132 : vector<2x128xf32>
    %c0_70 = arith.constant 0 : index
    %c0_71 = arith.constant 0 : index
    %c0_72 = arith.constant 0 : index
    %134 = vector.load %arg9[%c0_70, %c0_71, %c0_72] : memref<1x2x128xf32, #tpu.memory_space<vmem>>, vector<1x2x128xf32>
    %135 = vector.shape_cast %134 : vector<1x2x128xf32> to vector<2x128xf32>
    %136 = vector.shape_cast %133 : vector<2x128xf32> to vector<1x2x128xf32>
    tpu.vector_store %arg9[%c0_70, %c0_71, %c0_72], %136 {strides = array<i32>} : memref<1x2x128xf32, #tpu.memory_space<vmem>>, vector<1x2x128xf32>,
    return
  }
  func.func @transform_0(%arg0: i32) -> (i32, i32, i32) {
    %c0_i32 = arith.constant 0 : i32
    %c0_i32_0 = arith.constant 0 : i32
    %c0_i32_1 = arith.constant 0 : i32
    return %arg0, %c0_i32, %c0_i32_0 : i32, i32, i32
  }
  func.func @transform_1(%arg0: i32) -> (i32, i32, i32) {
    %c0_i32 = arith.constant 0 : i32
    %c0_i32_0 = arith.constant 0 : i32
    %c0_i32_1 = arith.constant 0 : i32
    return %arg0, %c0_i32, %c0_i32_0 : i32, i32, i32
  }
  func.func @transform_2(%arg0: i32) -> (i32, i32, i32) {
    %c0_i32 = arith.constant 0 : i32
    %c0_i32_0 = arith.constant 0 : i32
    %c0_i32_1 = arith.constant 0 : i32
    return %arg0, %c0_i32, %c0_i32_0 : i32, i32, i32
  }
  func.func @transform_3(%arg0: i32) -> (i32, i32, i32) {
    %c0_i32 = arith.constant 0 : i32
    %c0_i32_0 = arith.constant 0 : i32
    %c0_i32_1 = arith.constant 0 : i32
    return %arg0, %c0_i32, %c0_i32_0 : i32, i32, i32
  }
  func.func @transform_4(%arg0: i32) -> (i32, i32, i32) {
    %c0_i32 = arith.constant 0 : i32
    %c0_i32_0 = arith.constant 0 : i32
    %c0_i32_1 = arith.constant 0 : i32
    return %arg0, %c0_i32, %c0_i32_0 : i32, i32, i32
  }
  func.func @transform_5(%arg0: i32) -> (i32, i32) {
    %c0_i32 = arith.constant 0 : i32
    %c0_i32_0 = arith.constant 0 : i32
    %c0_i32_1 = arith.constant 0 : i32
    return %c0_i32, %c0_i32_0 : i32, i32
  }
  func.func @transform_6(%arg0: i32) -> (i32, i32, i32) {
    %c0_i32 = arith.constant 0 : i32
    %c0_i32_0 = arith.constant 0 : i32
    %c0_i32_1 = arith.constant 0 : i32
    %c0_i32_2 = arith.constant 0 : i32
    return %c0_i32, %c0_i32_0, %c0_i32_1 : i32, i32, i32
  }
  func.func @transform_7(%arg0: i32) -> (i32, i32) {
    %c0_i32 = arith.constant 0 : i32
    %c0_i32_0 = arith.constant 0 : i32
    %c0_i32_1 = arith.constant 0 : i32
    return %c0_i32, %c0_i32_0 : i32, i32
  }
  func.func @transform_8(%arg0: i32) -> (i32, i32, i32) {
    %c0_i32 = arith.constant 0 : i32
    %c0_i32_0 = arith.constant 0 : i32
    %c0_i32_1 = arith.constant 0 : i32
    return %arg0, %c0_i32, %c0_i32_0 : i32, i32, i32
  }
}

</mosaic_0001>

<bundles_post_ra>
// kernel: tpu_custom_call.1
= control target key start
LH: loop header
LB: loop body
LE: loop exit
PB: predicated region body
PF: predicated region fallthrough
CT: control target
= control target key end

     0   :  { %s3380_s0 = inlined_call_operand.hbm [shape: f32[4,32,128], index: 0, kind: input, shape index: {}]   ;;  %s3381_s1 = inlined_call_operand.vmem [shape: f32[4,64,128], index: 1, kind: input, shape index: {}]   ;;  %s3382_s2 = inlined_call_operand.vmem [shape: s32[4,64,1], index: 2, kind: input, shape index: {}]   ;;  %s3383_s3 = inlined_call_operand.hbm [shape: s32[4,1,64], index: 3, kind: input, shape index: {}]   ;;  %s3384_s4 = inlined_call_operand.hbm [shape: s32[4,1,32], index: 4, kind: input, shape index: {}]   ;;  %s3385_s5 = inlined_call_operand.hbm [shape: bf16[128,256], index: 5, kind: input, shape index: {}]   ;;  %s3386_s6 = inlined_call_operand.hbm [shape: bf16[6,128,128], index: 6, kind: input, shape index: {}]   ;;  %s3387_s7 = inlined_call_operand.vmem [shape: f32[12,128], index: 7, kind: input, shape index: {}]   ;;  %s3388_s8 = inlined_call_operand.hbm [shape: f32[4,2,128], index: 8, kind: output, shape index: {}]  }
   0x1   :  { %3408 = sst [smem:[#allocation21_spill]] %s3383_s3 }
   0x2   :  { %3409 = sst [smem:[#allocation22_spill]] %s3385_s5 }
   0x3   :  { %3410 = sst [smem:[#allocation23_spill]] %s3388_s8 }
   0x4   :  { %13 = vsyncpa [#allocation3], 0 }
   0x5   :  { %15 = vsyncpa [#allocation3 + $0x1], 0 }
   0x6   :  { %16 = vsyncpa [#allocation6], 0 }
   0x7   :  { %18 = vsyncpa [#allocation6 + $0x1], 0 }
   0x8   :  { %19 = vsyncpa [#allocation9], 0 }
   0x9   :  { %20 = vsyncpa [#allocation4], 0 }
   0xa   :  { %22 = vsyncpa [#allocation4 + $0x1], 0  ;;  %s2865_s27 = smov 0   ;;  %s2867_s28 = smov 0  }
   0xb   :  { %s2869_s29 = smov 0   ;;  %s2871_s30 = smov 0  }
   0xc LB: > { %3411 = sst [smem:[#allocation16_spill]] %s2793_s27  ;;  %s2886_s9 = sadd.s32 4294967295, %s2805_s30   ;;  %s2805_s30 = sphi %s2871_s30, %s3443_s30   ;;  %s2801_s29 = sphi %s2869_s29, %s3445_s29   ;;  %s2797_s28 = sphi %s2867_s28, %s3447_s28   ;;  %s2793_s27 = sphi %s2865_s27, %s3446_s27  }
   0xd   : > { %3412 = sst [smem:[#allocation17_spill]] %s2801_s29  ;;  %s2034_s10 = sadd.s32 4294967294, %s2805_s30  }
   0xe   : > { %p48_p0 = scmp.ne.s32.totalorder %s2797_s28, %s2793_s27  ;;  %p3389_p1 = scmp.eq.s32.totalorder %s2886_s9, 0 }
   0xf   : > { %p245_p3 = scmp.eq.s32.totalorder %s2034_s10, 3  ;;  %p2035_p5 = scmp.ge.s32.totalorder %s2805_s30, 1 }
  0x10   : > { %p2895_p4 = por %p3389_p1, %p48_p0  ;;  %p252_p7 = scmp.lt.s32.totalorder %s2805_s30, 5 }
  0x11   : > { %p2900_p6 = por %p245_p3, %p48_p0  ;;  %s2807_s14 = smov [#allocation8]  }
  0x12   : > { %s3413_s11 = scalar_select %p2895_p4, 1, 0 }
  0x13   : > { %s3414_s12 = scalar_select %p2900_p6, 1, 0 }
  0x14   : > { %p2905_p8 = pnand %p2035_p5, %p252_p7  ;;  %s264_s15 = sshll.u32 %s2807_s14, 4  ;;  %s265_s15 = int_to_ptr.vmem [resolvable:$true] %s264_s15 }
  0x15   : > { %3415 = sst [smem:[#allocation18_spill]] %s3414_s12  ;;  %s2918_s17 = sadd.s32 1, %s2805_s30  }
  0x16   : > { %s3416_s13 = scalar_select %p2905_p8, 1, 0 }
  0x17   : > { %p2441_p9 = pneg %p2905_p8  ;;  %3418 = sst [smem:[#allocation19_spill]] %s2918_s17 }
  0x18   : > { %s35_s18 = sadd.s32 1, %s2801_s29  ;;  %s32_s19 = ssub.s32 %s2805_s30, %s2918_s17 }
  0x19   : > { %p2913_p10 = pnand %p2441_p9, %p3389_p1  ;;  %s3419_s5 = sld [smem:[#allocation22_spill]] }
  0x1b   : > { %s3417_s16 = scalar_select %p2913_p10, 1, 0 }
  0x1c   : > { %p3397_p12 = pneg %p2913_p10 }
  0x1f   : > { %s2585_s22 = scalar_lea.hbm %s3419_s5, 2048 }
  0x20   : > { %p2586_p11 = scmp.ne.s32.totalorder %s3419_s5, %s2585_s22  ;;  %p2592_p3 = scmp.lt.u32.totalorder %s2585_s22, %s3419_s5 }
  0x22   : > { %p2588_p13 = pnand %p3397_p12, %p2586_p11 }
  0x24   : > { %p2589_p0 = pneg %p2588_p13 }
  0x26   : > { %p2594_p5 = pnand %p2592_p3, %p2589_p0 }
  0x28   : > { %2597 = shalt.err (!%p2594_p5)
}
  0x29   : > { %s2598_s10 = scalar_lea.vmem %s265_s15, 2048  ;;  %p2606_p2 = scmp.lt.s32.totalorder %s265_s15, %s265_s15 }
  0x2a   : > { %p2599_p7 = scmp.ne.s32.totalorder %s265_s15, %s2598_s10  ;;  %p2607_p6 = scmp.lt.s32.totalorder %s2598_s10, %s2598_s10 }
  0x2c   : > { %p2601_p9 = pnand %p2599_p7, %p3397_p12  ;;  %p2608_p4 = por %p2607_p6, %p2606_p2 }
  0x2e   : > { %p2602_p1 = pneg %p2601_p9 }
  0x30   : > { %p2609_p8 = pnand %p2608_p4, %p2602_p1 }
  0x32   : > { %2612 = shalt.err (!%p2609_p8)
}
  0x33   : > { %s3392_s14 = smov 128   ;;  %s3393_s20 = smov 8  }
  0x34   : > { %2444 = dma.hbm_to_vmem [thread:$0]  (!%p2913_p10), %s3419_s5, 2048, %s265_s15, [#allocation9], %s3392_s14, %s3392_s14, %s3393_s20  }
  0x35   : > { %p33_p1 = scmp.eq.s32.totalorder %s32_s19, 0  ;;  %p42_p2 = scmp.ne.s32.totalorder %s2801_s29, %s2797_s28 }
  0x36   : > { %p43_p4 = scmp.eq.s32.totalorder %s2805_s30, 0  ;;  %p2464_p6 = scmp.lt.s32.totalorder %s2805_s30, 4 }
  0x37   : > { %s2953_s23 = scalar_select %p33_p1, %s2801_s29, %s35_s18  }
  0x38   : > { %p44_p8 = por %p43_p4, %p42_p2  ;;  %p3421_p11 = scmp.eq.s32.totalorder %s2886_s9, 3 }
  0x39   : > { %3420 = sst [smem:[#allocation20_spill]] %s2953_s23  ;;  %s2962_s25 = sand.u32 1, %s2801_s29  }
  0x3a   : > { %p2957_p13 = por %p3421_p11, %p42_p2  ;;  %s331_s26 = sand.u32 1, %s2805_s30  }
  0x3b   : > { %p2965_p0 = pnand %p2464_p6, %p44_p8  ;;  %s2042_s15 = sshll.u32 %s2805_s30, 4 }
  0x3c   : > { %s3422_s24 = scalar_select %p2957_p13, 1, 0 }
  0x3d   : > { %s3423_s10 = scalar_select %p2965_p0, 1, 0 }
  0x3e   : > { %s3424_s3 = sld [smem:[#allocation21_spill]]  ;;  %s334_s22 = scalar_lea.vmem [#allocation5], %s2962_s25 }
  0x3f   : > { %s341_s14 = sshll.u32 %s334_s22, 4  ;;  %s2979_s23 = scalar_lea.hbm %s3384_s4, %s2042_s15  ;;  %s2981_s14 = int_to_ptr.vmem [resolvable:$true] %s341_s14 }
  0x40   : > { %s2983_s29 = scalar_lea.sflag [#allocation6], %s331_s26  ;;  %p2989_p5 = pneg %p2965_p0 }
  0x42   : > { %s3425_s19 = scalar_select %p2989_p5, 1, 0 }
  0x44   : > { %s2973_s18 = scalar_lea.hbm %s3424_s3, %s2042_s15  ;;  %s2618_s5 = scalar_lea.hbm %s3424_s3, 64 }
  0x45   : > { %s2613_s17 = scalar_lea.hbm %s2973_s18, 16  ;;  %p2619_p1 = scmp.lt.u32.totalorder %s2973_s18, %s3424_s3 }
  0x46   : > { %p2614_p3 = scmp.ne.s32.totalorder %s2973_s18, %s2613_s17  ;;  %p2620_p2 = scmp.lt.u32.totalorder %s2618_s5, %s2613_s17 }
  0x47   : > { %p2622_p6 = scmp.lt.u32.totalorder %s2613_s17, %s2973_s18 }
  0x48   : > { %p2616_p7 = pnand %p2989_p5, %p2614_p3  ;;  %p2621_p4 = por %p2620_p2, %p2619_p1 }
  0x4a   : > { %p2617_p9 = pneg %p2616_p7  ;;  %p2623_p8 = por %p2622_p6, %p2621_p4 }
  0x4c   : > { %p2624_p11 = pnand %p2623_p8, %p2617_p9 }
  0x4e   : > { %2627 = shalt.err (!%p2624_p11)
}
  0x4f   : > { %s2628_s26 = scalar_lea.vmem %s2981_s14, 16  ;;  %s2810_s21 = smov [#allocation5]  }
  0x50   : > { %p2629_p3 = scmp.ne.s32.totalorder %s2981_s14, %s2628_s26  ;;  %s2633_s22 = sshll.u32 %s2810_s21, 4  ;;  %s2634_s22 = int_to_ptr.vmem [resolvable:$false] %s2633_s22 }
  0x51   : > { %s2635_s20 = scalar_lea.vmem %s2634_s22, 32  ;;  %p2636_p13 = scmp.lt.s32.totalorder %s2981_s14, %s2634_s22 }
  0x52   : > { %p2631_p7 = pnand %p2629_p3, %p2989_p5  ;;  %p2637_p10 = scmp.lt.s32.totalorder %s2635_s20, %s2628_s26 }
  0x54   : > { %p2632_p12 = pneg %p2631_p7  ;;  %p2638_p1 = por %p2637_p10, %p2636_p13 }
  0x56   : > { %p2639_p2 = pnand %p2638_p1, %p2632_p12 }
  0x58   : > { %2642 = shalt.err (!%p2639_p2)
}
  0x59   : > { %2454 = dma.hbm_to_vmem [thread:$0]  (!%p2965_p0), %s2973_s18, 16, %s2981_s14, %s2983_s29  }
  0x5a   : > { %s2811_s17 = smov [#allocation10]   ;;  %s2643_s21 = scalar_lea.hbm %s3386_s6, 6144 }
  0x5b   : > { %s277_s5 = sshll.u32 %s2811_s17, 4  ;;  %p2644_p10 = scmp.ne.s32.totalorder %s3386_s6, %s2643_s21  ;;  %s278_s5 = int_to_ptr.vmem [resolvable:$true] %s277_s5 }
  0x5c   : > { %p3426_p12 = scmp.ne.s32.totalorder %s3417_s16, 0  ;;  %p2650_p6 = scmp.lt.u32.totalorder %s2643_s21, %s3386_s6 }
  0x5e   : > { %p3427_p13 = pneg %p3426_p12 }
  0x60   : > { %p2646_p9 = pnand %p2644_p10, %p3427_p13 }
  0x62   : > { %p2647_p4 = pneg %p2646_p9 }
  0x64   : > { %p2652_p8 = pnand %p2650_p6, %p2647_p4 }
  0x66   : > { %2655 = shalt.err (!%p2652_p8)
}
  0x67   : > { %s2656_s14 = scalar_lea.vmem %s278_s5, 6144  ;;  %p3428_p3 = pmov %p3427_p13 }
  0x68   : > { %p2657_p11 = scmp.ne.s32.totalorder %s278_s5, %s2656_s14  ;;  %p2664_p2 = scmp.lt.s32.totalorder %s278_s5, %s278_s5 }
  0x69   : > { %p2665_p0 = scmp.lt.s32.totalorder %s2656_s14, %s2656_s14 }
  0x6a   : > { %p2659_p7 = pnand %p2657_p11, %p3428_p3 }
  0x6b   : > { %p2666_p5 = por %p2665_p0, %p2664_p2 }
  0x6c   : > { %p2660_p1 = pneg %p2659_p7 }
  0x6e   : > { %p2667_p10 = pnand %p2666_p5, %p2660_p1 }
  0x70   : > { %2670 = shalt.err (!%p2667_p10)
}
  0x71   : > { %s2812_s3 = smov 64   ;;  %s2813_s12 = smov 4  }
  0x72   : > { %2447 = dma.hbm_to_vmem [thread:$0]  (!%p3426_p12), %s3386_s6, 6144, %s278_s5, [#allocation9], %s2812_s3, %s2812_s3, %s2813_s12  }
  0x73   : > { %s2039_s15 = sshll.u32 %s2962_s25, 5  ;;  %s2161_s21 = sshll.u32 %s2805_s30, 9 }
  0x74   : > { %s3038_s20 = scalar_lea.hbm %s3380_s0, %s2161_s21  ;;  %s298_s14 = scalar_lea.vmem [#allocation2], %s2039_s15 }
  0x75   : > { %s305_s27 = sshll.u32 %s298_s14, 4  ;;  %s295_s16 = scalar_lea.sflag [#allocation3], %s2962_s25  ;;  %s3040_s27 = int_to_ptr.vmem [resolvable:$true] %s305_s27 }
  0x76   : > { %s2671_s8 = scalar_lea.hbm %s3038_s20, 512  ;;  %p3429_p5 = scmp.ne.s32.totalorder %s3425_s19, 0 }
  0x77   : > { %p2672_p0 = scmp.ne.s32.totalorder %s3038_s20, %s2671_s8  ;;  %s2676_s12 = scalar_lea.hbm %s3380_s0, 2048 }
  0x78   : > { %p2677_p9 = scmp.lt.u32.totalorder %s3038_s20, %s3380_s0  ;;  %p2678_p4 = scmp.lt.u32.totalorder %s2676_s12, %s2671_s8 }
  0x79   : > { %p2674_p12 = pnand %p2672_p0, %p3429_p5  ;;  %p2680_p8 = scmp.lt.u32.totalorder %s2671_s8, %s3038_s20 }
  0x7a   : > { %p2679_p6 = por %p2678_p4, %p2677_p9 }
  0x7b   : > { %p2675_p13 = pneg %p2674_p12 }
  0x7c   : > { %p2681_p11 = por %p2680_p8, %p2679_p6 }
  0x7e   : > { %p2682_p3 = pnand %p2681_p11, %p2675_p13 }
  0x80   : > { %2685 = shalt.err (!%p2682_p3)
}
  0x81   : > { %s2686_s15 = scalar_lea.vmem %s3040_s27, 512  ;;  %s2814_s21 = smov [#allocation2]  }
  0x82   : > { %p2687_p7 = scmp.ne.s32.totalorder %s3040_s27, %s2686_s15  ;;  %s2691_s22 = sshll.u32 %s2814_s21, 4  ;;  %s2692_s22 = int_to_ptr.vmem [resolvable:$false] %s2691_s22 }
  0x83   : > { %s2693_s26 = scalar_lea.vmem %s2692_s22, 1024  ;;  %p2694_p10 = scmp.lt.s32.totalorder %s3040_s27, %s2692_s22 }
  0x84   : > { %p2689_p1 = pnand %p2687_p7, %p3429_p5  ;;  %p2695_p0 = scmp.lt.s32.totalorder %s2693_s26, %s2686_s15 }
  0x86   : > { %p2690_p2 = pneg %p2689_p1  ;;  %p2696_p12 = por %p2695_p0, %p2694_p10 }
  0x88   : > { %p2697_p9 = pnand %p2696_p12, %p2690_p2 }
  0x8a   : > { %2700 = shalt.err (!%p2697_p9)
}
  0x8b   : > { %p3430_p13 = scmp.ne.s32.totalorder %s3423_s10, 0  ;;  %s3431_s8 = smov 8  }
  0x8c   : > { %s3432_s14 = smov 128   ;;  %s351_s5 = scalar_lea.vmem [#allocation7], %s2962_s25 }
  0x8d   : > { %2451 = dma.hbm_to_vmem [thread:$0]  (!%p3430_p13), %s3038_s20, 512, %s3040_s27, %s295_s16, %s3432_s14, %s3432_s14, %s3431_s8  }
  0x8e   : > { %s358_s3 = sshll.u32 %s351_s5, 4  ;;  %s2701_s12 = scalar_lea.hbm %s2979_s23, 16  ;;  %s359_s3 = int_to_ptr.vmem [resolvable:$true] %s358_s3 }
  0x8f   : > { %p2702_p4 = scmp.ne.s32.totalorder %s2979_s23, %s2701_s12  ;;  %s2706_s15 = scalar_lea.hbm %s3384_s4, 64 }
  0x90   : > { %p2707_p11 = scmp.lt.u32.totalorder %s2979_s23, %s3384_s4  ;;  %p2708_p3 = scmp.lt.u32.totalorder %s2706_s15, %s2701_s12 }
  0x91   : > { %p2704_p6 = pnand %p2702_p4, %p3429_p5  ;;  %p2710_p1 = scmp.lt.u32.totalorder %s2701_s12, %s2979_s23 }
  0x92   : > { %p2709_p7 = por %p2708_p3, %p2707_p11 }
  0x93   : > { %p2705_p8 = pneg %p2704_p6 }
  0x94   : > { %p2711_p2 = por %p2710_p1, %p2709_p7 }
  0x96   : > { %p2712_p10 = pnand %p2711_p2, %p2705_p8 }
  0x98   : > { %2715 = shalt.err (!%p2712_p10)
}
  0x99   : > { %s2716_s27 = scalar_lea.vmem %s359_s3, 16  ;;  %s2815_s25 = smov [#allocation7]  }
  0x9a   : > { %p2717_p0 = scmp.ne.s32.totalorder %s359_s3, %s2716_s27  ;;  %s2721_s20 = sshll.u32 %s2815_s25, 4  ;;  %s2722_s20 = int_to_ptr.vmem [resolvable:$false] %s2721_s20 }
  0x9b   : > { %s2723_s16 = scalar_lea.vmem %s2722_s20, 32  ;;  %p2724_p4 = scmp.lt.s32.totalorder %s359_s3, %s2722_s20 }
  0x9c   : > { %p2719_p12 = pnand %p2717_p0, %p3429_p5  ;;  %p2725_p6 = scmp.lt.s32.totalorder %s2723_s16, %s2716_s27 }
  0x9e   : > { %p2720_p9 = pneg %p2719_p12  ;;  %p2726_p13 = por %p2725_p6, %p2724_p4 }
  0xa0   : > { %p2727_p3 = pnand %p2726_p13, %p2720_p9 }
  0xa2   : > { %2730 = shalt.err (!%p2727_p3)
}
  0xa3   : > { %p3433_p11 = scmp.ne.s32.totalorder %s3423_s10, 0  ;;  %p3434_p8 = scmp.ne.s32.totalorder %s3416_s13, 0 }
  0xa4   : > { %s3091_s19 = sand.u32 (!%p3434_p8), 1, %s2797_s28   ;;  %p3435_p5 = scmp.ne.s32.totalorder (!%p3434_p8), %s3413_s11, 0 }
  0xa5   : > { %2457 = dma.hbm_to_vmem [thread:$0]  (!%p3433_p11), %s2979_s23, 16, %s359_s3, %s2983_s29  }
  0xa6   : > { %367 = sbr.rel (%p3434_p8) target bundleno = 2813 (0xafd), region = 52  ;;  %s2045_s26 = sshll.u32 (!%p3434_p8), %s3091_s19, 5 }
  0xa7   : > { %s370_s8 = scalar_lea.sflag (!%p3434_p8), [#allocation3], %s3091_s19  ;;  %s3095_s14 = scalar_lea.vmem (!%p3434_p8), [#allocation2], %s2045_s26 }
  0xad   : > { %2776 = dma.done.wait (%p3435_p5), %s370_s8, 512  }
  0xae   : > { %2778 = vsyncadd (%p3435_p5), %s370_s8, 4294966784  ;;  %s378_s29 = sand.u32 1, %s2886_s9   ;;  %s381_s23 = scalar_lea.vmem [#allocation5], %s3091_s19 }
  0xaf   : > { %s379_s13 = scalar_lea.sflag [#allocation6], %s378_s29 }
  0xb0   : > { %2780 = dma.done.wait (%p3435_p5), %s379_s13, 32  }
  0xb1   : > { %2782 = vsyncadd (%p3435_p5), %s379_s13, 4294967264  ;;  %s389_s10 = scalar_lea.vmem [#allocation7], %s3091_s19  ;;  %p3436_p13 = scmp.eq.s32.totalorder %s2886_s9, 0 }
  0xb3   : > { %2784 = dma.done.wait (%p3436_p13), [#allocation9], 8192   ;;  %p3437_p7 = pmov %p3436_p13 }
  0xb4   : > { %p448_p1 = scmp.lt.s32.totalorder %s2886_s9, 3  ;;  %v2816_v0 = vmov 0   ;;  %v2511_v5 = vld [vmem:[#allocation8 + $0x4] ss:$8 sps:$4 sm:$0xff]   ;;  %v2513_v6 = vld [vmem:[#allocation8] ss:$8 sps:$4 sm:$0xff]   ;;  %v481_v43 = vlaneseq }
  0xb5   : > { %2786 = vsyncadd (%p3437_p7), [#allocation9], 4294959104  ;;  %2510 = vset.pattern.permute.xlu1 %v2816_v0  ;;  %2509 = vset.pattern.permute.xlu0 %v2816_v0  ;;  %v2514_v7 = vld [vmem:[#allocation8 + $0x14] ss:$8 sps:$4 sm:$0xff]   ;;  %v2516_v10 = vld [vmem:[#allocation8 + $0x10] ss:$8 sps:$4 sm:$0xff]  }
  0xb6   : > { %s3116_s5 = scalar_select %p448_p1, %s2886_s9, 3  ;;  %706 = vmatprep.mubr.bf16.mxu0 %v2816_v0  ;;  %674 = vmatprep.subr.bf16.mxu0 %v2511_v5  ;;  %v2517_v11 = vld [vmem:[#allocation8 + $0x24] ss:$8 sps:$4 sm:$0xff]   ;;  %v2519_v14 = vld [vmem:[#allocation8 + $0x20] ss:$8 sps:$4 sm:$0xff]   ;;  %v3135_v20 = vld [vmem:[%s3095_s14 + $0x18] sm:$0xff] }
  0xb7   : > { %675 = vmatpush1.bf16.msra.mxu0 %v2513_v6  ;;  %v2520_v15 = vld [vmem:[#allocation8 + $0x34] ss:$8 sps:$4 sm:$0xff]   ;;  %v2522_v16 = vld [vmem:[#allocation8 + $0x30] ss:$8 sps:$4 sm:$0xff]   ;;  %v3129_v18 = vld [vmem:[%s3095_s14 + $0x8] sm:$0xff]  ;;  %v482_v44 = vand.u32 127, %v481_v43 }
  0xb8   : > { %s2162_s11 = sshll.u32 %s3116_s5, 6  ;;  %676 = vmatprep.subr.bf16.mxu0 %v2514_v7  ;;  %v3126_v17 = vld [vmem:[%s3095_s14] sm:$0xff]  ;;  %v3132_v19 = vld [vmem:[%s3095_s14 + $0x10] sm:$0xff]  ;;  %vm799_vm4 = vcmask 261120   ;;  %v2817_v49 = vmov 0.0   ;;  %vm889_vm11 = vcmask 523264  }
  0xb9   : > { %s457_s18 = scalar_lea.vmem %s3382_s2, %s2162_s11  ;;  %v2523_v21 = vld [vmem:[#allocation8 + $0x44] ss:$8 sps:$4 sm:$0xff]   ;;  %v797_v22 = vpack.c.bf16 %v3129_v18, %v3126_v17  ;;  %v798_v23 = vpack.c.bf16 %v3135_v20, %v3132_v19  ;;  %v2525_v24 = vld [vmem:[#allocation8 + $0x40] ss:$8 sps:$4 sm:$0xff]   ;;  %v2526_v25 = vld [vmem:[#allocation8 + $0x54] ss:$8 sps:$4 sm:$0xff]   ;;  %s452_s21 = scalar_lea.vmem %s3381_s1, %s2162_s11 }
  0xba   : > { %v473_v1 = vld [vmem:[%s457_s18 + $0x10] sm:$0xff]  ;;  %v471_v2 = vld [vmem:[%s457_s18] sm:$0xff]  ;;  %v474_v3 = vld [vmem:[%s457_s18 + $0x18] sm:$0xff]  ;;  %vm2818_vm15 = vmmov 0   ;;  %s2048_s25 = sshll.u32 %s3091_s19, 1  ;;  %s2158_s26 = sshll.u32 %s2886_s9, 5 }
  0xbb   : > { %490 = vperm.xlu1 %2510, %v473_v1   ;;  %484 = vperm.xlu0 %2509, %v471_v2   ;;  %v472_v4 = vld [vmem:[%s457_s18 + $0x8] sm:$0xff]  ;;  %v475_v9 = vld [vmem:[%s457_s18 + $0x20] sm:$0xff]  ;;  %v478_v12 = vld [vmem:[%s457_s18 + $0x38] sm:$0xff]  ;;  %v3173_v2 = vshrl.u32 %v481_v43, 7  ;;  %s447_s8 = scalar_lea.vmem [#allocation11], %s2048_s25  ;;  %s1871_s11 = scalar_lea.sflag [#allocation4], %s3091_s19 }
  0xbc   : > { %v476_v8 = vld [vmem:[%s457_s18 + $0x28] sm:$0xff]  ;;  %v477_v13 = vld [vmem:[%s457_s18 + $0x30] sm:$0xff]  ;;  %677 = vmatpush1.bf16.msra.mxu0 %v2516_v10  ;;  %2249 = vmatprep.subr.bf16.mxu1 %v797_v22  ;;  %v2532_v29 = vld [vmem:[#allocation8 + $0x74] ss:$8 sps:$4 sm:$0xff]   ;;  %s1884_s14 = sshll.u32 %s447_s8, 4  ;;  %p3439_p10 = scmp.ne.s32.totalorder %s3422_s24, 0  ;;  %s3339_s14 = int_to_ptr.vmem [resolvable:$true] %s1884_s14 }
  0xbd   : > { %678 = vmatprep.subr.bf16.mxu0 %v2517_v11  ;;  %2250 = vmatpush3.bf16.msra.mxu1 %v797_v22  ;;  %v2528_v26 = vld [vmem:[#allocation8 + $0x50] ss:$8 sps:$4 sm:$0xff]   ;;  %v2529_v27 = vld [vmem:[#allocation8 + $0x64] ss:$8 sps:$4 sm:$0xff]   ;;  %v2531_v28 = vld [vmem:[#allocation8 + $0x60] ss:$8 sps:$4 sm:$0xff]  }
  0xbe   : > { %2251 = vmatprep.subr.bf16.mxu1 %v798_v23  ;;  %v2534_v30 = vld [vmem:[#allocation8 + $0x70] ss:$8 sps:$4 sm:$0xff]   ;;  %v463_v31 = vld [vmem:[%s452_s21] sm:$0xff]  ;;  %v464_v32 = vld [vmem:[%s452_s21 + $0x8] sm:$0xff]  ;;  %s2731_s9 = scalar_lea.vmem %s3339_s14, 32  ;;  %s2819_s3 = smov [#allocation11]  }
  0xbf   : > { %493 = vperm.xlu1 %2510, %v474_v3   ;;  %487 = vperm.xlu0 %2509, %v472_v4   ;;  %v574_v33 = vpack.c.bf16 %v464_v32, %v463_v31  ;;  %v465_v34 = vld [vmem:[%s452_s21 + $0x10] sm:$0xff]  ;;  %v466_v35 = vld [vmem:[%s452_s21 + $0x18] sm:$0xff]  ;;  %v467_v37 = vld [vmem:[%s452_s21 + $0x20] sm:$0xff]  ;;  %v537_v3 = vadd.s32 8, %v3173_v2  ;;  %p2732_p2 = scmp.ne.s32.totalorder %s3339_s14, %s2731_s9  ;;  %s2735_s12 = sshll.u32 %s2819_s3, 4  ;;  %s2736_s12 = int_to_ptr.vmem [resolvable:$false] %s2735_s12 }
  0xc0   : > { %679 = vmatpush1.bf16.msra.mxu0 %v2519_v14  ;;  %v575_v36 = vpack.c.bf16 %v466_v35, %v465_v34  ;;  %v468_v38 = vld [vmem:[%s452_s21 + $0x28] sm:$0xff]  ;;  %v469_v40 = vld [vmem:[%s452_s21 + $0x30] sm:$0xff]  ;;  %v470_v41 = vld [vmem:[%s452_s21 + $0x38] sm:$0xff]  ;;  %s2737_s18 = scalar_lea.vmem %s2736_s12, 64  ;;  %p2738_p9 = scmp.lt.s32.totalorder %s3339_s14, %s2736_s12 }
  0xc1   : > { %680 = vmatprep.subr.bf16.mxu0 %v2520_v15  ;;  %2252 = vmatpush3.bf16.msra.mxu1 %v798_v23  ;;  %v576_v39 = vpack.c.bf16 %v468_v38, %v467_v37  ;;  %v577_v42 = vpack.c.bf16 %v470_v41, %v469_v40  ;;  %v3178_v4 = vld [vmem:[%s381_s23] ss:$0 sm:$0xff]  ;;  %s3438_s23 = sld [smem:[#allocation23_spill]]  ;;  %p2733_p0 = pnand %p2732_p2, %p3439_p10 }
  0xc2   : > { %vm544_vm9 = vcmp.eq.s32.totalorder %v3178_v4, %v3173_v2  ;;  %vm545_vm10 = vcmp.eq.s32.totalorder %v3178_v4, %v537_v3  ;;  %p2739_p4 = scmp.lt.s32.totalorder %s2737_s18, %s2731_s9 }
  0xc3   : > { %499 = vperm.xlu1 %2510, %v476_v8   ;;  %496 = vperm.xlu0 %2509, %v475_v9   ;;  %v2062_v5 = vsel %vm544_vm9, 1.0, %v2817_v49  ;;  %v2063_v6 = vsel %vm545_vm10, 1.0, %v2817_v49  ;;  %p2734_p12 = pneg %p2733_p0 }
  0xc4   : > { %681 = vmatpush1.bf16.msra.mxu0 %v2522_v16  ;;  %v3185_v7 = vpack.c.bf16 %v2063_v6, %v2062_v5  ;;  %p2740_p6 = por %p2739_p4, %p2738_p9 }
  0xc5   : > { %682 = vmatprep.subr.bf16.mxu0 %v2523_v21 }
  0xc6   : > { %p2741_p3 = pnand %p2740_p6, %p2734_p12 }
  0xc7   : > { %505 = vperm.xlu1 %2510, %v478_v12   ;;  %502 = vperm.xlu0 %2509, %v477_v13   ;;  %s3337_s5 = scalar_lea.hbm %s3438_s23, %s2158_s26 }
  0xc8   : > { %683 = vmatpush1.bf16.msra.mxu0 %v2525_v24 }
  0xc9   : > { %684 = vmatprep.subr.bf16.mxu0 %v2526_v25 }
  0xcc   : > { %685 = vmatpush1.bf16.msra.mxu0 %v2528_v26 }
  0xcd   : > { %686 = vmatprep.subr.bf16.mxu0 %v2529_v27 }
  0xd0   : > { %687 = vmatpush1.bf16.msra.mxu0 %v2531_v28  ;;  %v2084_v28 = vld [vmem:[%s3387_s7] ss:$0 sm:$0xff] }
  0xd1   : > { %688 = vmatprep.subr.bf16.mxu0 %v2532_v29 }
  0xd4   : > { %689 = vmatpush1.bf16.msra.mxu0 %v2534_v30 }
  0xd7   : > { %707 = vmatmul.mubr.bf16.vlgmr.msra.gmra.mrb[0].mxu0 %v574_v33 }
  0xd8   : > { %716 = vmatprep.mubr.bf16.mxu0 %v2816_v0 }
  0xdf   : > { %717 = vmatmul.mubr.bf16.gmra.mrb[4].mxu0 %v575_v36 }
  0xe0   : > { %726 = vmatprep.mubr.bf16.mxu0 %v2816_v0 }
  0xe7   : > { %727 = vmatmul.mubr.bf16.gmra.mrb[8].mxu0 %v576_v39 }
  0xe8   : > { %736 = vmatprep.mubr.bf16.mxu0 %v2816_v0 }
  0xef   : > { %737 = vmatmul.mubr.bf16.gmra.mrb[12].mxu0 %v577_v42 }
 0x13a   : > { %v491_v45 = vpop.permute.xlu1 %490  ;;  %v485_v46 = vpop.permute.xlu0 %484 }
 0x13b   : > { %vm509_vm0 = vcmp.eq.s32.totalorder %v491_v45, %v482_v44  ;;  %vm507_vm1 = vcmp.eq.s32.totalorder %v485_v46, %v482_v44 }
 0x13c   : > { %v2055_v50 = vsel %vm509_vm0, 1.0, %v2817_v49  ;;  %v2053_v51 = vsel %vm507_vm1, 1.0, %v2817_v49  ;;  %vm567_vm0 = vcmask 254976  }
 0x13e   : > { %v494_v47 = vpop.permute.xlu1 %493  ;;  %v488_v48 = vpop.permute.xlu0 %487 }
 0x13f   : > { %vm510_vm2 = vcmp.eq.s32.totalorder %v494_v47, %v482_v44  ;;  %vm508_vm3 = vcmp.eq.s32.totalorder %v488_v48, %v482_v44 }
 0x140   : > { %v2056_v52 = vsel %vm510_vm2, 1.0, %v2817_v49  ;;  %v2054_v53 = vsel %vm508_vm3, 1.0, %v2817_v49 }
 0x141   : > { %v3153_v54 = vpack.c.bf16 %v2056_v52, %v2055_v50  ;;  %v3155_v55 = vpack.c.bf16 %v2054_v53, %v2053_v51 }
 0x142   : > { %v500_v56 = vpop.permute.xlu1 %499  ;;  %v497_v57 = vpop.permute.xlu0 %496 }
 0x143   : > { %vm512_vm5 = vcmp.eq.s32.totalorder %v500_v56, %v482_v44  ;;  %vm511_vm6 = vcmp.eq.s32.totalorder %v497_v57, %v482_v44  ;;  %2253 = vmatprep.mubr.msk.bf16.mxu1 %vm799_vm4, %v3155_v55 }
 0x144   : > { %v2058_v58 = vsel %vm512_vm5, 1.0, %v2817_v49  ;;  %v2057_v59 = vsel %vm511_vm6, 1.0, %v2817_v49  ;;  %2254 = vmatmul.mubr.msk.bf16.vlgmr.msra.gmra.mrb[0].mxu1 %vm799_vm4, %v3153_v54 }
 0x145   : > { %v3163_v60 = vpack.c.bf16 %v2058_v58, %v2057_v59 }
 0x146   : > { %v506_v61 = vpop.permute.xlu1 %505  ;;  %v503_v62 = vpop.permute.xlu0 %502 }
 0x147   : > { %vm514_vm7 = vcmp.eq.s32.totalorder %v506_v61, %v482_v44  ;;  %vm513_vm8 = vcmp.eq.s32.totalorder %v503_v62, %v482_v44  ;;  %2257 = vmatprep.mubr.msk.bf16.mxu1 %vm799_vm4, %v3163_v60 }
 0x148   : > { %v2060_v63 = vsel %vm514_vm7, 1.0, %v2817_v49  ;;  %v2059_v0 = vsel %vm513_vm8, 1.0, %v2817_v49 }
 0x149   : > { %v3169_v1 = vpack.c.bf16 %v2060_v63, %v2059_v0  ;;  %v538_v63 = vadd.s32 16, %v3173_v2  ;;  %v539_v0 = vadd.s32 24, %v3173_v2 }
 0x14b   : > { %vm546_vm12 = vcmp.eq.s32.totalorder %v3178_v4, %v538_v63  ;;  %vm547_vm13 = vcmp.eq.s32.totalorder %v3178_v4, %v539_v0  ;;  %v2538_v4 = vld [vmem:[#allocation10 + $0x18] sm:$0xff]  }
 0x14c   : > { %2258 = vmatmul.mubr.msk.bf16.gmra.mrb[4].mxu1 %vm799_vm4, %v3169_v1 }
 0x14d   : > { %2269 = vmatprep.mubr.msk.bf16.mxu1 %vm889_vm11, %v3185_v7 }
 0x1aa   : > { %v708_v8 = vpop.f32.mrb[0].mxu0 }
 0x1ab   : > { %v3189_v9 = vpop.f32.mrb[1].mxu0  ;;  %v789_v30 = vadd.f32 %v2084_v28, %v708_v8 }
 0x1ac   : > { %v712_v10 = vpop.f32.mrb[2].mxu0 }
 0x1ad   : > { %v3191_v11 = vpop.f32.mrb[3].mxu0  ;;  %v790_v35 = vadd.f32 %v2084_v28, %v712_v10 }
 0x1b2   : > { %v718_v12 = vpop.f32.mrb[4].mxu0 }
 0x1b3   : > { %v3193_v13 = vpop.f32.mrb[5].mxu0  ;;  %v791_v29 = vadd.f32 %v2084_v28, %v718_v12 }
 0x1b4   : > { %v722_v14 = vpop.f32.mrb[6].mxu0 }
 0x1b5   : > { %v3195_v15 = vpop.f32.mrb[7].mxu0  ;;  %v792_v32 = vadd.f32 %v2084_v28, %v722_v14  ;;  %v2064_v14 = vsel %vm546_vm12, 1.0, %v2817_v49 }
 0x1ba   : > { %v728_v16 = vpop.f32.mrb[8].mxu0 }
 0x1bb   : > { %v3197_v21 = vpop.f32.mrb[9].mxu0  ;;  %v793_v48 = vadd.f32 %v2084_v28, %v728_v16  ;;  %v2065_v16 = vsel %vm547_vm13, 1.0, %v2817_v49 }
 0x1bc   : > { %v732_v22 = vpop.f32.mrb[10].mxu0 }
 0x1bd   : > { %v3199_v23 = vpop.f32.mrb[11].mxu0  ;;  %v794_v56 = vadd.f32 %v2084_v28, %v732_v22  ;;  %v2535_v22 = vld [vmem:[#allocation10] sm:$0xff]  }
 0x1c2   : > { %v738_v24 = vpop.f32.mrb[12].mxu0 }
 0x1c3   : > { %v3201_v25 = vpop.f32.mrb[13].mxu0  ;;  %v795_v43 = vadd.f32 %v2084_v28, %v738_v24  ;;  %v3214_v24 = vpack.c.bf16 %v2065_v16, %v2064_v14  ;;  %v2109_v14 = vld [vmem:[%s3387_s7 + $0x3] ss:$0 sm:$0xff] }
 0x1c4   : > { %v742_v26 = vpop.f32.mrb[14].mxu0 }
 0x1c5   : > { %v3203_v27 = vpop.f32.mrb[15].mxu0  ;;  %v796_v47 = vadd.f32 %v2084_v28, %v742_v26  ;;  %v2536_v26 = vld [vmem:[#allocation10 + $0x8] sm:$0xff]   ;;  %v2537_v28 = vld [vmem:[#allocation10 + $0x10] sm:$0xff]  }
 0x217   : > { %v2255_v31 = vpop.f32.mrb[0].mxu1 }
 0x218   : > { %v855_v33 = vadd.f32 %v2255_v31, %v791_v29  ;;  %v846_v34 = vpop.f32.mrb[1].mxu1  ;;  %v2539_v29 = vld [vmem:[#allocation10 + $0x20] sm:$0xff]   ;;  %v2541_v31 = vld [vmem:[#allocation10 + $0x30] sm:$0xff]  }
 0x219   : > { %v847_v36 = vadd.f32 %v846_v34, %v789_v30  ;;  %v2256_v37 = vpop.f32.mrb[2].mxu1  ;;  %v2540_v30 = vld [vmem:[#allocation10 + $0x28] sm:$0xff]  }
 0x21a   : > { %v858_v38 = vadd.f32 %v2256_v37, %v792_v32  ;;  %v849_v39 = vpop.f32.mrb[3].mxu1  ;;  %v879_v41 = vmax.f32 %v855_v33, 0.0  ;;  %v2542_v32 = vld [vmem:[#allocation10 + $0x38] sm:$0xff]   ;;  %v2543_v33 = vld [vmem:[#allocation10 + $0x40] sm:$0xff]   ;;  %v2544_v34 = vld [vmem:[#allocation10 + $0x48] sm:$0xff]  }
 0x21b   : > { %v850_v40 = vadd.f32 %v849_v39, %v790_v35  ;;  %v877_v44 = vmax.f32 %v847_v36, 0.0  ;;  %2293 = vmatprep.subr.bf16.mxu0 %v2543_v33  ;;  %v2545_v35 = vld [vmem:[#allocation10 + $0x50] sm:$0xff]   ;;  %v2546_v36 = vld [vmem:[#allocation10 + $0x58] sm:$0xff]   ;;  %v2547_v37 = vld [vmem:[#allocation10 + $0x60] sm:$0xff]  }
 0x21c   : > { %v880_v42 = vmax.f32 %v858_v38, 0.0  ;;  %2294 = vmatpush3.bf16.msra.mxu0 %v2543_v33  ;;  %v2548_v38 = vld [vmem:[#allocation10 + $0x68] sm:$0xff]  }
 0x21d   : > { %v878_v45 = vmax.f32 %v850_v40, 0.0  ;;  %2295 = vmatprep.subr.bf16.mxu0 %v2544_v34 }
 0x21e   : > { %v886_v46 = vpack.c.bf16 %v880_v42, %v879_v41 }
 0x21f   : > { %v885_v50 = vpack.c.bf16 %v878_v45, %v877_v44  ;;  %v2259_v51 = vpop.f32.mrb[4].mxu1 }
 0x220   : > { %v871_v52 = vadd.f32 %v2259_v51, %v795_v43  ;;  %v862_v53 = vpop.f32.mrb[5].mxu1  ;;  %2296 = vmatpush3.bf16.msra.mxu0 %v2544_v34  ;;  %v2550_v51 = vld [vmem:[#allocation10 + $0x78] sm:$0xff]  }
 0x221   : > { %v863_v57 = vadd.f32 %v862_v53, %v793_v48  ;;  %v2260_v58 = vpop.f32.mrb[6].mxu1  ;;  %2261 = vmatprep.subr.bf16.mxu1 %v885_v50  ;;  %2297 = vmatprep.subr.bf16.mxu0 %v2545_v35 }
 0x222   : > { %v874_v59 = vadd.f32 %v2260_v58, %v796_v47  ;;  %v865_v61 = vpop.f32.mrb[7].mxu1  ;;  %2262 = vmatpush3.bf16.msra.mxu1 %v885_v50  ;;  %v883_v3 = vmax.f32 %v871_v52, 0.0  ;;  %v2549_v50 = vld [vmem:[#allocation10 + $0x70] sm:$0xff]  }
 0x223   : > { %v866_v62 = vadd.f32 %v865_v61, %v794_v56  ;;  %2263 = vmatprep.subr.bf16.mxu1 %v886_v46  ;;  %v881_v6 = vmax.f32 %v863_v57, 0.0 }
 0x224   : > { %v884_v5 = vmax.f32 %v874_v59, 0.0  ;;  %2298 = vmatpush3.bf16.msra.mxu0 %v2545_v35 }
 0x225   : > { %v882_v8 = vmax.f32 %v866_v62, 0.0  ;;  %2299 = vmatprep.subr.bf16.mxu0 %v2546_v36 }
 0x226   : > { %v888_v10 = vpack.c.bf16 %v884_v5, %v883_v3  ;;  %2264 = vmatpush3.bf16.msra.mxu1 %v886_v46  ;;  %v2100_v3 = vld [vmem:[%s3387_s7 + $0x2] ss:$0 sm:$0xff] }
 0x227   : > { %v887_v12 = vpack.c.bf16 %v882_v8, %v881_v6 }
 0x228   : > { %2300 = vmatpush3.bf16.msra.mxu0 %v2546_v36 }
 0x229   : > { %2265 = vmatprep.subr.bf16.mxu1 %v887_v12  ;;  %2301 = vmatprep.subr.bf16.mxu0 %v2547_v37 }
 0x22a   : > { %2266 = vmatpush3.bf16.msra.mxu1 %v887_v12 }
 0x22b   : > { %2267 = vmatprep.subr.bf16.mxu1 %v888_v10 }
 0x22c   : > { %2302 = vmatpush3.bf16.msra.mxu0 %v2547_v37 }
 0x22d   : > { %2303 = vmatprep.subr.bf16.mxu0 %v2548_v38 }
 0x22e   : > { %2268 = vmatpush3.bf16.msra.mxu1 %v888_v10 }
 0x22f   : > { %2273 = vmatprep.subr.bf16.mxu1 %v2535_v22 }
 0x230   : > { %2304 = vmatpush3.bf16.msra.mxu0 %v2548_v38 }
 0x231   : > { %2270 = vmatmul.mubr.msk.bf16.vlgmr.msra.gmra.mrb[8].mxu1 %vm889_vm11, %v3214_v24  ;;  %2305 = vmatprep.subr.bf16.mxu0 %v2549_v50 }
 0x232   : > { %2274 = vmatpush3.bf16.msra.mxu1 %v2535_v22 }
 0x233   : > { %2275 = vmatprep.subr.bf16.mxu1 %v2536_v26 }
 0x234   : > { %2306 = vmatpush3.bf16.msra.mxu0 %v2549_v50  ;;  %v2555_v50 = vld [vmem:[#allocation10 + $0xa0] sm:$0xff]  }
 0x235   : > { %2307 = vmatprep.subr.bf16.mxu0 %v2550_v51 }
 0x236   : > { %2276 = vmatpush3.bf16.msra.mxu1 %v2536_v26 }
 0x237   : > { %2277 = vmatprep.subr.bf16.mxu1 %v2537_v28 }
 0x238   : > { %2308 = vmatpush3.bf16.msra.mxu0 %v2550_v51 }
 0x23a   : > { %2278 = vmatpush3.bf16.msra.mxu1 %v2537_v28 }
 0x23b   : > { %2279 = vmatprep.subr.bf16.mxu1 %v2538_v4 }
 0x23e   : > { %2280 = vmatpush3.bf16.msra.mxu1 %v2538_v4 }
 0x23f   : > { %2281 = vmatprep.subr.bf16.mxu1 %v2539_v29 }
 0x242   : > { %2282 = vmatpush3.bf16.msra.mxu1 %v2539_v29 }
 0x243   : > { %2283 = vmatprep.subr.bf16.mxu1 %v2540_v30 }
 0x246   : > { %2284 = vmatpush3.bf16.msra.mxu1 %v2540_v30 }
 0x247   : > { %2285 = vmatprep.subr.bf16.mxu1 %v2541_v31 }
 0x24a   : > { %2286 = vmatpush3.bf16.msra.mxu1 %v2541_v31 }
 0x24b   : > { %2287 = vmatprep.subr.bf16.mxu1 %v2542_v32 }
 0x24e   : > { %2288 = vmatpush3.bf16.msra.mxu1 %v2542_v32 }
 0x304   : > { %v2271_v39 = vpop.f32.mrb[8].mxu1 }
 0x305   : > { %v930_v40 = vpop.f32.mrb[9].mxu1  ;;  %v947_v42 = vadd.f32 %v2271_v39, %v3132_v19  ;;  %v2091_v19 = vld [vmem:[%s3387_s7 + $0x1] ss:$0 sm:$0xff] }
 0x306   : > { %v2272_v41 = vpop.f32.mrb[10].mxu1  ;;  %v945_v45 = vadd.f32 %v930_v40, %v3126_v17 }
 0x307   : > { %v948_v43 = vadd.f32 %v2272_v41, %v3135_v20  ;;  %v933_v44 = vpop.f32.mrb[11].mxu1 }
 0x308   : > { %v946_v46 = vadd.f32 %v933_v44, %v3129_v18 }
 0x309   : > { %v950_v47 = vpack.c.bf16 %v948_v43, %v947_v42 }
 0x30a   : > { %v949_v48 = vpack.c.bf16 %v946_v46, %v945_v45  ;;  %v2551_v45 = vld [vmem:[#allocation10 + $0x80] sm:$0xff]   ;;  %v2552_v46 = vld [vmem:[#allocation10 + $0x88] sm:$0xff]  }
 0x30c   : > { %2289 = vmatprep.mubr.bf16.mxu1 %v949_v48  ;;  %v2554_v48 = vld [vmem:[#allocation10 + $0x98] sm:$0xff]  }
 0x30d   : > { %2290 = vmatmul.mubr.bf16.vlgmr.msra.gmra.mrb[12].mxu1 %v950_v47  ;;  %v2553_v47 = vld [vmem:[#allocation10 + $0x90] sm:$0xff]  }
 0x30e   : > { %2317 = vmatprep.mubr.msk.bf16.mxu1 %vm799_vm4, %v3155_v55 }
 0x3e0   : > { %v2291_v17 = vpop.f32.mrb[12].mxu1 }
 0x3e1   : > { %v1046_v20 = vadd.f32 %v2291_v17, %v2091_v19  ;;  %v1037_v18 = vpop.f32.mrb[13].mxu1 }
 0x3e2   : > { %v1038_v52 = vadd.f32 %v2091_v19, %v1037_v18  ;;  %v2292_v53 = vpop.f32.mrb[14].mxu1 }
 0x3e3   : > { %v1049_v56 = vadd.f32 %v2292_v53, %v2091_v19  ;;  %v1040_v57 = vpop.f32.mrb[15].mxu1  ;;  %v1054_v59 = vmax.f32 %v1046_v20, 0.0 }
 0x3e4   : > { %v1041_v58 = vadd.f32 %v2091_v19, %v1040_v57  ;;  %v1052_v61 = vmax.f32 %v1038_v52, 0.0 }
 0x3e5   : > { %v1055_v55 = vmax.f32 %v1049_v56, 0.0 }
 0x3e6   : > { %v1053_v62 = vmax.f32 %v1041_v58, 0.0 }
 0x3e7   : > { %v1057_v63 = vpack.c.bf16 %v1055_v55, %v1054_v59 }
 0x3e8   : > { %v1056_v0 = vpack.c.bf16 %v1053_v62, %v1052_v61 }
 0x3ea   : > { %2309 = vmatprep.mubr.bf16.mxu0 %v1056_v0 }
 0x3eb   : > { %2310 = vmatmul.mubr.bf16.vlgmr.msra.gmra.mrb[16].mxu0 %v1057_v63 }
 0x3ec   : > { %2333 = vmatprep.mubr.msk.bf16.mxu0 %vm889_vm11, %v3185_v7  ;;  %v2110_v7 = vld [vmem:[%s3387_s7 + $0x4] ss:$0 sm:$0xff] }
 0x4be   : > { %v2311_v5 = vpop.f32.mrb[16].mxu0 }
 0x4bf   : > { %v1153_v6 = vadd.f32 %v2311_v5, %v2100_v3  ;;  %v1144_v8 = vpop.f32.mrb[17].mxu0 }
 0x4c0   : > { %v1145_v10 = vadd.f32 %v2100_v3, %v1144_v8  ;;  %v2312_v12 = vpop.f32.mrb[18].mxu0 }
 0x4c1   : > { %v1161_v16 = vmax.f32 %v1153_v6, 0.0  ;;  %v1156_v22 = vadd.f32 %v2312_v12, %v2100_v3  ;;  %v1147_v26 = vpop.f32.mrb[19].mxu0 }
 0x4c2   : > { %v1159_v28 = vmax.f32 %v1145_v10, 0.0  ;;  %v1148_v4 = vadd.f32 %v2100_v3, %v1147_v26 }
 0x4c3   : > { %v1162_v29 = vmax.f32 %v1156_v22, 0.0  ;;  %v1169_v30 = vmul.f32 %v2109_v14, %v1161_v16 }
 0x4c4   : > { %v1167_v31 = vmul.f32 %v2109_v14, %v1159_v28  ;;  %v1160_v32 = vmax.f32 %v1148_v4, 0.0 }
 0x4c5   : > { %v1170_v33 = vmul.f32 %v2109_v14, %v1162_v29  ;;  %v3242_v37 = vadd.f32 %v2110_v7, %v1169_v30  ;;  %v2559_v29 = vld [vmem:[#allocation10 + $0xc0] sm:$0xff]   ;;  %v2560_v30 = vld [vmem:[#allocation10 + $0xc8] sm:$0xff]  }
 0x4c6   : > { %v3238_v34 = vadd.f32 %v2110_v7, %v1167_v31  ;;  %v1168_v35 = vmul.f32 %v2109_v14, %v1160_v32  ;;  %v2561_v31 = vld [vmem:[#allocation10 + $0xd0] sm:$0xff]   ;;  %v2562_v32 = vld [vmem:[#allocation10 + $0xd8] sm:$0xff]  }
 0x4c7   : > { %v3240_v36 = vadd.f32 %v2110_v7, %v1170_v33  ;;  %v1181_v42 = vmax.f32 %v3242_v37, 0.0  ;;  %v2564_v33 = vld [vmem:[#allocation10 + $0xe8] sm:$0xff]  }
 0x4c8   : > { %v3244_v38 = vadd.f32 %v2110_v7, %v1168_v35  ;;  %v1179_v39 = vmax.f32 %v3238_v34, 0.0  ;;  %v2118_v34 = vld [vmem:[%s3387_s7 + $0x6] ss:$0 sm:$0xff] }
 0x4c9   : > { %v1182_v40 = vmax.f32 %v3240_v36, 0.0 }
 0x4ca   : > { %v1180_v41 = vmax.f32 %v3244_v38, 0.0 }
 0x4cb   : > { %v1235_v44 = vpack.c.bf16 %v1182_v40, %v1181_v42 }
 0x4cc   : > { %v1234_v43 = vpack.c.bf16 %v1180_v41, %v1179_v39 }
 0x4ce   : > { %2313 = vmatprep.subr.bf16.mxu1 %v1234_v43 }
 0x4cf   : > { %2314 = vmatpush3.bf16.msra.mxu1 %v1234_v43 }
 0x4d0   : > { %2315 = vmatprep.subr.bf16.mxu1 %v1235_v44 }
 0x4d3   : > { %2316 = vmatpush3.bf16.msra.mxu1 %v1235_v44 }
 0x4d4   : > { %2337 = vmatprep.subr.bf16.mxu1 %v2551_v45 }
 0x4d6   : > { %2318 = vmatmul.mubr.msk.bf16.vlgmr.msra.gmra.mrb[16].mxu1 %vm799_vm4, %v3153_v54  ;;  %v2556_v54 = vld [vmem:[#allocation10 + $0xa8] sm:$0xff]  }
 0x4d7   : > { %2321 = vmatprep.mubr.msk.bf16.mxu1 %vm799_vm4, %v3163_v60  ;;  %2338 = vmatpush3.bf16.msra.mxu1 %v2551_v45  ;;  %v2111_v60 = vld [vmem:[%s3387_s7 + $0x5] ss:$0 sm:$0xff] }
 0x4d8   : > { %2339 = vmatprep.subr.bf16.mxu1 %v2552_v46  ;;  %v1226_v51 = vadd.f32 %v2111_v60, %v3189_v9  ;;  %v1229_v17 = vadd.f32 %v2111_v60, %v3195_v15  ;;  %v1227_v52 = vadd.f32 %v2111_v60, %v3191_v11  ;;  %v1230_v9 = vadd.f32 %v2111_v60, %v3197_v21 }
 0x4d9   : > { %v1233_v5 = vadd.f32 %v2111_v60, %v3203_v27  ;;  %v1231_v8 = vadd.f32 %v2111_v60, %v3199_v23  ;;  %v2557_v23 = vld [vmem:[#allocation10 + $0xb0] sm:$0xff]   ;;  %v2558_v27 = vld [vmem:[#allocation10 + $0xb8] sm:$0xff]  }
 0x4db   : > { %2340 = vmatpush3.bf16.msra.mxu1 %v2552_v46 }
 0x4dc   : > { %2341 = vmatprep.subr.bf16.mxu1 %v2553_v47 }
 0x4de   : > { %2322 = vmatmul.mubr.msk.bf16.gmra.mrb[20].mxu1 %vm799_vm4, %v3169_v1  ;;  %v1228_v1 = vadd.f32 %v2111_v60, %v3193_v13  ;;  %v1232_v13 = vadd.f32 %v2111_v60, %v3201_v25 }
 0x4df   : > { %2342 = vmatpush3.bf16.msra.mxu1 %v2553_v47 }
 0x4e0   : > { %2343 = vmatprep.subr.bf16.mxu1 %v2554_v48 }
 0x4e3   : > { %2344 = vmatpush3.bf16.msra.mxu1 %v2554_v48 }
 0x4e4   : > { %2345 = vmatprep.subr.bf16.mxu1 %v2555_v50 }
 0x4e7   : > { %2346 = vmatpush3.bf16.msra.mxu1 %v2555_v50 }
 0x4e8   : > { %2347 = vmatprep.subr.bf16.mxu1 %v2556_v54 }
 0x4eb   : > { %2348 = vmatpush3.bf16.msra.mxu1 %v2556_v54 }
 0x4ec   : > { %2349 = vmatprep.subr.bf16.mxu1 %v2557_v23 }
 0x4ef   : > { %2350 = vmatpush3.bf16.msra.mxu1 %v2557_v23 }
 0x4f0   : > { %2351 = vmatprep.subr.bf16.mxu1 %v2558_v27 }
 0x4f3   : > { %2352 = vmatpush3.bf16.msra.mxu1 %v2558_v27 }
 0x4f4   : > { %2377 = vmatprep.subr.bf16.mxu1 %v2817_v49 }
 0x5a9   : > { %v2319_v19 = vpop.f32.mrb[16].mxu1 }
 0x5aa   : > { %v1279_v20 = vadd.f32 %v2319_v19, %v1228_v1  ;;  %v1270_v18 = vpop.f32.mrb[17].mxu1  ;;  %v2565_v1 = vld [vmem:[#allocation10 + $0xf0] sm:$0xff]  }
 0x5ab   : > { %v1271_v53 = vadd.f32 %v1270_v18, %v1226_v51  ;;  %v2320_v56 = vpop.f32.mrb[18].mxu1  ;;  %v2566_v51 = vld [vmem:[#allocation10 + $0xf8] sm:$0xff]  }
 0x5ac   : > { %v1282_v57 = vadd.f32 %v2320_v56, %v1229_v17  ;;  %v1273_v58 = vpop.f32.mrb[19].mxu1  ;;  %v1303_v55 = vmax.f32 %v1279_v20, 0.0 }
 0x5ad   : > { %v1274_v59 = vadd.f32 %v1273_v58, %v1227_v52  ;;  %v1301_v62 = vmax.f32 %v1271_v53, 0.0 }
 0x5ae   : > { %v1304_v61 = vmax.f32 %v1282_v57, 0.0  ;;  %v2066_v57 = vld [vmem:[%s389_s10] ss:$0 sm:$0xff] }
 0x5af   : > { %v1302_v63 = vmax.f32 %v1274_v59, 0.0  ;;  %vm562_vm14 = vcmp.eq.s32.totalorder %v2066_v57, %v3173_v2  ;;  %v2136_v2 = vld [vmem:[%s3387_s7 + $0x8] ss:$0 sm:$0xff] }
 0x5b0   : > { %v1310_v0 = vpack.c.bf16 %v1304_v61, %v1303_v55  ;;  %v2067_v58 = vsel %vm562_vm14, 1.0, %v2817_v49  ;;  %v2127_v55 = vld [vmem:[%s3387_s7 + $0x7] ss:$0 sm:$0xff] }
 0x5b1   : > { %v1309_v3 = vpack.c.bf16 %v1302_v63, %v1301_v62  ;;  %v2323_v15 = vpop.f32.mrb[20].mxu1  ;;  %v568_v59 = vsel %vm567_vm0, %v2067_v58, 0.0 }
 0x5b2   : > { %v1295_v6 = vadd.f32 %v2323_v15, %v1232_v13  ;;  %v1286_v11 = vpop.f32.mrb[21].mxu1  ;;  %569 = vadd.xlane.f32.xlu0 %v568_v59 }
 0x5b3   : > { %v1287_v10 = vadd.f32 %v1286_v11, %v1230_v9  ;;  %v2324_v12 = vpop.f32.mrb[22].mxu1  ;;  %2325 = vmatprep.subr.bf16.mxu0 %v1309_v3 }
 0x5b4   : > { %v1298_v14 = vadd.f32 %v2324_v12, %v1233_v5  ;;  %v1289_v16 = vpop.f32.mrb[23].mxu1  ;;  %2326 = vmatpush3.bf16.msra.mxu0 %v1309_v3  ;;  %v1307_v25 = vmax.f32 %v1295_v6, 0.0  ;;  %v2137_v5 = vld [vmem:[%s3387_s7 + $0x9] ss:$0 sm:$0xff] }
 0x5b5   : > { %v1290_v22 = vadd.f32 %v1289_v16, %v1231_v8  ;;  %2327 = vmatprep.subr.bf16.mxu0 %v1310_v0  ;;  %v1305_v28 = vmax.f32 %v1287_v10, 0.0 }
 0x5b6   : > { %v1308_v26 = vmax.f32 %v1298_v14, 0.0 }
 0x5b7   : > { %v1306_v21 = vmax.f32 %v1290_v22, 0.0 }
 0x5b8   : > { %v1312_v4 = vpack.c.bf16 %v1308_v26, %v1307_v25  ;;  %2328 = vmatpush3.bf16.msra.mxu0 %v1310_v0 }
 0x5b9   : > { %v1311_v7 = vpack.c.bf16 %v1306_v21, %v1305_v28 }
 0x5bb   : > { %2329 = vmatprep.subr.bf16.mxu0 %v1311_v7 }
 0x5bc   : > { %2330 = vmatpush3.bf16.msra.mxu0 %v1311_v7 }
 0x5bd   : > { %2331 = vmatprep.subr.bf16.mxu0 %v1312_v4 }
 0x5c0   : > { %2332 = vmatpush3.bf16.msra.mxu0 %v1312_v4 }
 0x5c1   : > { %2357 = vmatprep.subr.bf16.mxu0 %v2559_v29 }
 0x5c3   : > { %2334 = vmatmul.mubr.msk.bf16.vlgmr.msra.gmra.mrb[20].mxu0 %vm889_vm11, %v3214_v24  ;;  %v2563_v24 = vld [vmem:[#allocation10 + $0xe0] sm:$0xff]  }
 0x5c4   : > { %2358 = vmatpush3.bf16.msra.mxu0 %v2559_v29 }
 0x5c5   : > { %2359 = vmatprep.subr.bf16.mxu0 %v2560_v30 }
 0x5c8   : > { %2360 = vmatpush3.bf16.msra.mxu0 %v2560_v30 }
 0x5c9   : > { %2361 = vmatprep.subr.bf16.mxu0 %v2561_v31 }
 0x5cc   : > { %2362 = vmatpush3.bf16.msra.mxu0 %v2561_v31  ;;  %v565_v31 = vpack.c.bf16 %v2067_v58, %v2067_v58 }
 0x5cd   : > { %2363 = vmatprep.subr.bf16.mxu0 %v2562_v32 }
 0x5d0   : > { %2364 = vmatpush3.bf16.msra.mxu0 %v2562_v32  ;;  %v2567_v32 = vld [vmem:[#allocation10 + $0x100] sm:$0xff]  }
 0x5d1   : > { %2365 = vmatprep.subr.bf16.mxu0 %v2563_v24 }
 0x5d4   : > { %2366 = vmatpush3.bf16.msra.mxu0 %v2563_v24  ;;  %v2568_v24 = vld [vmem:[#allocation10 + $0x108] sm:$0xff]  }
 0x5d5   : > { %2367 = vmatprep.subr.bf16.mxu0 %v2564_v33 }
 0x5d8   : > { %2368 = vmatpush3.bf16.msra.mxu0 %v2564_v33  ;;  %v2569_v33 = vld [vmem:[#allocation10 + $0x110] sm:$0xff]  }
 0x5d9   : > { %2369 = vmatprep.subr.bf16.mxu0 %v2565_v1 }
 0x5dc   : > { %2370 = vmatpush3.bf16.msra.mxu0 %v2565_v1  ;;  %v2580_v1 = vld [vmem:[#allocation10 + $0x168] sm:$0xff]  }
 0x5dd   : > { %2371 = vmatprep.subr.bf16.mxu0 %v2566_v51 }
 0x5e0   : > { %2372 = vmatpush3.bf16.msra.mxu0 %v2566_v51 }
 0x5e1   : > { %2405 = vmatprep.subr.bf16.mxu0 %v2817_v49 }
 0x63f   : > { %v570_v51 = vpop.xlane.xlu0 %569 }
 0x696   : > { %v2335_v35 = vpop.f32.mrb[20].mxu0 }
 0x697   : > { %v1347_v43 = vpop.f32.mrb[21].mxu0  ;;  %v1364_v45 = vadd.f32 %v2335_v35, %v1181_v42  ;;  %v2570_v35 = vld [vmem:[#allocation10 + $0x118] sm:$0xff]  }
 0x698   : > { %v2336_v44 = vpop.f32.mrb[22].mxu0  ;;  %v1362_v48 = vadd.f32 %v1347_v43, %v1179_v39  ;;  %v2571_v43 = vld [vmem:[#allocation10 + $0x120] sm:$0xff]  }
 0x699   : > { %v1365_v46 = vadd.f32 %v2336_v44, %v1182_v40  ;;  %v1350_v47 = vpop.f32.mrb[23].mxu0  ;;  %v2572_v44 = vld [vmem:[#allocation10 + $0x128] sm:$0xff]  }
 0x69a   : > { %v1363_v50 = vadd.f32 %v1350_v47, %v1180_v41  ;;  %v2575_v47 = vld [vmem:[#allocation10 + $0x140] sm:$0xff]  }
 0x69b   : > { %v1367_v54 = vpack.c.bf16 %v1365_v46, %v1364_v45  ;;  %v2573_v45 = vld [vmem:[#allocation10 + $0x130] sm:$0xff]   ;;  %v2574_v46 = vld [vmem:[#allocation10 + $0x138] sm:$0xff]  }
 0x69c   : > { %v1366_v60 = vpack.c.bf16 %v1363_v50, %v1362_v48  ;;  %v2576_v48 = vld [vmem:[#allocation10 + $0x148] sm:$0xff]   ;;  %v2577_v50 = vld [vmem:[#allocation10 + $0x150] sm:$0xff]  }
 0x69e   : > { %2353 = vmatprep.mubr.bf16.mxu1 %v1366_v60  ;;  %v2579_v60 = vld [vmem:[#allocation10 + $0x160] sm:$0xff]  }
 0x69f   : > { %2354 = vmatmul.mubr.bf16.vlgmr.msra.gmra.mrb[24].mxu1 %v1367_v54  ;;  %v2578_v54 = vld [vmem:[#allocation10 + $0x158] sm:$0xff]  }
 0x6a0   : > { %2381 = vmatprep.mubr.msk.bf16.mxu1 %vm2818_vm15, %v2817_v49 }
 0x772   : > { %v2355_v36 = vpop.f32.mrb[24].mxu1 }
 0x773   : > { %v1463_v37 = vadd.f32 %v2355_v36, %v2118_v34  ;;  %v1454_v38 = vpop.f32.mrb[25].mxu1 }
 0x774   : > { %v1455_v39 = vadd.f32 %v2118_v34, %v1454_v38  ;;  %v2356_v40 = vpop.f32.mrb[26].mxu1 }
 0x775   : > { %v1466_v41 = vadd.f32 %v2356_v40, %v2118_v34  ;;  %v1457_v42 = vpop.f32.mrb[27].mxu1  ;;  %v1471_v17 = vmax.f32 %v1463_v37, 0.0 }
 0x776   : > { %v1458_v19 = vadd.f32 %v2118_v34, %v1457_v42  ;;  %v1469_v18 = vmax.f32 %v1455_v39, 0.0  ;;  %v571_v34 = vmax.f32 %v570_v51, 1.0 }
 0x777   : > { %v1472_v20 = vmax.f32 %v1466_v41, 0.0 }
 0x778   : > { %v1470_v52 = vmax.f32 %v1458_v19, 0.0  ;;  %2583 = vrcp.f32 %v571_v34  ;;  %v2581_v19 = vld [vmem:[#allocation10 + $0x170] sm:$0xff]  }
 0x779   : > { %v1474_v53 = vpack.c.bf16 %v1472_v20, %v1471_v17  ;;  %v2582_v17 = vld [vmem:[#allocation10 + $0x178] sm:$0xff]   ;;  %v2139_v20 = vld [vmem:[%s3387_s7 + $0xa] ss:$0 sm:$0xff] }
 0x77a   : > { %v1473_v56 = vpack.c.bf16 %v1470_v52, %v1469_v18 }
 0x77c   : > { %2373 = vmatprep.mubr.bf16.mxu0 %v1473_v56 }
 0x77d   : > { %2374 = vmatmul.mubr.bf16.vlgmr.msra.gmra.mrb[24].mxu0 %v1474_v53 }
 0x77e   : > { %2421 = vmatprep.mubr.msk.bf16.mxu0 %vm2818_vm15, %v2817_v49  ;;  %2406 = vmatpush3.bf16.msra.mxu0 %v2575_v47 }
 0x77f   : > { %2407 = vmatprep.subr.bf16.mxu0 %v2817_v49 }
 0x782   : > { %2408 = vmatpush3.bf16.msra.mxu0 %v2576_v48  ;;  %v2584_v36 = vpop.eup %2583 }
 0x783   : > { %2409 = vmatprep.subr.bf16.mxu0 %v2817_v49 }
 0x786   : > { %2410 = vmatpush3.bf16.msra.mxu0 %v2577_v50 }
 0x787   : > { %2411 = vmatprep.subr.bf16.mxu0 %v2817_v49 }
 0x78a   : > { %2412 = vmatpush3.bf16.msra.mxu0 %v2578_v54 }
 0x78b   : > { %2413 = vmatprep.subr.bf16.mxu0 %v2817_v49 }
 0x78e   : > { %2414 = vmatpush3.bf16.msra.mxu0 %v2579_v60 }
 0x78f   : > { %2415 = vmatprep.subr.bf16.mxu0 %v2817_v49 }
 0x792   : > { %2416 = vmatpush3.bf16.msra.mxu0 %v2580_v1 }
 0x793   : > { %2417 = vmatprep.subr.bf16.mxu0 %v2817_v49 }
 0x796   : > { %2418 = vmatpush3.bf16.msra.mxu0 %v2581_v19 }
 0x797   : > { %2419 = vmatprep.subr.bf16.mxu0 %v2817_v49 }
 0x79a   : > { %2420 = vmatpush3.bf16.msra.mxu0 %v2582_v17 }
 0x850   : > { %v2375_v61 = vpop.f32.mrb[24].mxu0 }
 0x851   : > { %v1570_v62 = vadd.f32 %v2375_v61, %v2127_v55  ;;  %v1561_v63 = vpop.f32.mrb[25].mxu0 }
 0x852   : > { %v1562_v13 = vadd.f32 %v2127_v55, %v1561_v63  ;;  %v2376_v0 = vpop.f32.mrb[26].mxu0 }
 0x853   : > { %v1578_v9 = vmax.f32 %v1570_v62, 0.0  ;;  %v1573_v3 = vadd.f32 %v2376_v0, %v2127_v55  ;;  %v1564_v15 = vpop.f32.mrb[27].mxu0 }
 0x854   : > { %v1576_v6 = vmax.f32 %v1562_v13, 0.0  ;;  %v1565_v11 = vadd.f32 %v2127_v55, %v1564_v15 }
 0x855   : > { %v1586_v8 = vmul.f32 %v2136_v2, %v1578_v9  ;;  %v1579_v10 = vmax.f32 %v1573_v3, 0.0 }
 0x856   : > { %v1584_v12 = vmul.f32 %v2136_v2, %v1576_v6  ;;  %v1577_v14 = vmax.f32 %v1565_v11, 0.0 }
 0x857   : > { %v1594_v16 = vadd.f32 %v2137_v5, %v1586_v8  ;;  %v1587_v22 = vmul.f32 %v2136_v2, %v1579_v10 }
 0x858   : > { %v1592_v25 = vadd.f32 %v2137_v5, %v1584_v12  ;;  %v1585_v26 = vmul.f32 %v2136_v2, %v1577_v14 }
 0x859   : > { %v1595_v28 = vadd.f32 %v2137_v5, %v1587_v22  ;;  %v1598_v4 = vmax.f32 %v1594_v16, 0.0 }
 0x85a   : > { %v1593_v21 = vadd.f32 %v2137_v5, %v1585_v26  ;;  %v1596_v23 = vmax.f32 %v1592_v25, 0.0 }
 0x85b   : > { %v1599_v7 = vmax.f32 %v1595_v28, 0.0 }
 0x85c   : > { %v1597_v27 = vmax.f32 %v1593_v21, 0.0 }
 0x85d   : > { %v1601_v29 = vpack.c.bf16 %v1599_v7, %v1598_v4 }
 0x85e   : > { %v1600_v30 = vpack.c.bf16 %v1597_v27, %v1596_v23 }
 0x860   : > { %2378 = vmatpush3.bf16.msra.mxu1 %v1600_v30 }
 0x861   : > { %2379 = vmatprep.subr.bf16.mxu1 %v2817_v49 }
 0x864   : > { %2380 = vmatpush3.bf16.msra.mxu1 %v1601_v29 }
 0x865   : > { %2385 = vmatprep.subr.bf16.mxu1 %v2817_v49 }
 0x867   : > { %2382 = vmatmul.mubr.msk.bf16.vlgmr.msra.gmra.mrb[28].mxu1 %vm799_vm4, %v565_v31 }
 0x868   : > { %2386 = vmatpush3.bf16.msra.mxu1 %v2567_v32  ;;  %2401 = vmatprep.mubr.msk.bf16.mxu1 %vm2818_vm15, %v2817_v49 }
 0x869   : > { %2387 = vmatprep.subr.bf16.mxu1 %v2817_v49 }
 0x86c   : > { %2388 = vmatpush3.bf16.msra.mxu1 %v2568_v24 }
 0x86d   : > { %2389 = vmatprep.subr.bf16.mxu1 %v2817_v49 }
 0x870   : > { %2390 = vmatpush3.bf16.msra.mxu1 %v2569_v33 }
 0x871   : > { %2391 = vmatprep.subr.bf16.mxu1 %v2817_v49 }
 0x874   : > { %2392 = vmatpush3.bf16.msra.mxu1 %v2570_v35 }
 0x875   : > { %2393 = vmatprep.subr.bf16.mxu1 %v2817_v49 }
 0x878   : > { %2394 = vmatpush3.bf16.msra.mxu1 %v2571_v43 }
 0x879   : > { %2395 = vmatprep.subr.bf16.mxu1 %v2817_v49 }
 0x87c   : > { %2396 = vmatpush3.bf16.msra.mxu1 %v2572_v44 }
 0x87d   : > { %2397 = vmatprep.subr.bf16.mxu1 %v2817_v49 }
 0x880   : > { %2398 = vmatpush3.bf16.msra.mxu1 %v2573_v45 }
 0x881   : > { %2399 = vmatprep.subr.bf16.mxu1 %v2817_v49  ;;  %v2148_v49 = vld [vmem:[%s3387_s7 + $0xb] ss:$0 sm:$0xff] }
 0x884   : > { %2400 = vmatpush3.bf16.msra.mxu1 %v2574_v46 }
 0x93a   : > { %v1639_v37 = vpop.f32.mrb[28].mxu1 }
 0x93b   : > { %v1645_v38 = vmul.f32 %v2584_v36, %v1639_v37  ;;  %v2383_v39 = vpop.f32.mrb[29].mxu1 }
 0x93c   : > { %v1642_v40 = vpop.f32.mrb[30].mxu1 }
 0x93d   : > { %v1682_v41 = vpack.c.bf16 %v1645_v38, %v1645_v38  ;;  %v2384_v42 = vpop.f32.mrb[31].mxu1 }
 0x93f   : > { %2402 = vmatmul.mubr.bf16.vlgmr.msra.gmra.mrb[32].mxu1 %v1682_v41 }
 0xa12   : > { %v1769_v18 = vpop.f32.mrb[32].mxu1 }
 0xa13   : > { %v1770_v52 = vadd.f32 %v2139_v20, %v1769_v18  ;;  %v2403_v53 = vpop.f32.mrb[33].mxu1 }
 0xa14   : > { %v1772_v56 = vpop.f32.mrb[34].mxu1 }
 0xa15   : > { %v1775_v57 = vmax.f32 %v1770_v52, 0.0  ;;  %v2404_v58 = vpop.f32.mrb[35].mxu1 }
 0xa17   : > { %v1776_v59 = vpack.c.bf16 %v1775_v57, %v1775_v57 }
 0xa19   : > { %2422 = vmatmul.mubr.bf16.vlgmr.msra.gmra.mrb[28].mxu0 %v1776_v59 }
 0xaec   : > { %v1863_v55 = vpop.f32.mrb[28].mxu0 }
 0xaed   : > { %v1864_v61 = vadd.f32 %v2148_v49, %v1863_v55  ;;  %v2423_v62 = vpop.f32.mrb[29].mxu0 }
 0xaee   : > { %v1866_v63 = vpop.f32.mrb[30].mxu0 }
 0xaef   : > { %1869 = vst [vmem:[%s447_s8] sm:$0x3] %v1864_v61  ;;  %v2424_v2 = vpop.f32.mrb[31].mxu0 }
 0xaf0   : > { %2744 = shalt.err (!%p2741_p3)
}
 0xaf1   : > { %s2745_s19 = scalar_lea.hbm %s3337_s5, 32  ;;  %s2749_s15 = scalar_lea.hbm %s3438_s23, 128 }
 0xaf2   : > { %p2746_p11 = scmp.ne.s32.totalorder %s3337_s5, %s2745_s19  ;;  %p2750_p13 = scmp.lt.u32.totalorder %s3337_s5, %s3438_s23 }
 0xaf3   : > { %p2751_p7 = scmp.lt.u32.totalorder %s2749_s15, %s2745_s19  ;;  %p2753_p2 = scmp.lt.u32.totalorder %s2745_s19, %s3337_s5 }
 0xaf4   : > { %p2747_p8 = pnand %p2746_p11, %p3439_p10 }
 0xaf5   : > { %p2752_p1 = por %p2751_p7, %p2750_p13 }
 0xaf6   : > { %p2748_p5 = pneg %p2747_p8 }
 0xaf7   : > { %p2754_p0 = por %p2753_p2, %p2752_p1 }
 0xaf9   : > { %p2755_p12 = pnand %p2754_p0, %p2748_p5 }
 0xafb   : > { %2758 = shalt.err (!%p2755_p12)
}
 0xafc   : > { %2439 = dma.vmem_to_hbm [thread:$0]  (%p3439_p10), %s3339_s14, 32, %s3337_s5, %s1871_s11  }
 0xafd PF: > { %s3440_s27 = sld [smem:[#allocation16_spill]]  ;;  %s3441_s25 = sld [smem:[#allocation18_spill]] }
 0xafe   : > { %p2467_p9 = scmp.ge.s32.totalorder %s2805_s30, 2 }
 0xb03   : > { %s1896_s20 = sand.u32 1, %s3440_s27   ;;  %p3442_p4 = scmp.ne.s32.totalorder %s3441_s25, 0 }
 0xb04   : > { %s1897_s16 = scalar_lea.sflag [#allocation4], %s1896_s20 }
 0xb05   : > { %p2459_p6 = pnand %p2467_p9, %p3442_p4 }
 0xb07   : > { %2788 = dma.done.wait (!%p2459_p6), %s1897_s16, 32  }
 0xb08   : > { %2790 = vsyncadd (!%p2459_p6), %s1897_s16, 4294967264  ;;  %s3443_s30 = sld [smem:[#allocation19_spill]]  ;;  %s3444_s26 = sld [smem:[#allocation17_spill]] }
 0xb09   : > { %s3445_s29 = sld [smem:[#allocation20_spill]]  ;;  %s3446_s27 = smov %s2797_s28 }
 0xb0e   : > { %p25_p3 = scmp.ge.s32.totalorder %s3443_s30, 6   ;;  %s3447_s28 = smov %s3444_s26 }
 0xb10   :  { %27 = sbr.rel (!%p25_p3) target bundleno = 12 (0xc), region = 140 }
 0xb17   :  { %1902 = vsyncpa [#allocation3], 1 }
 0xb18   :  { %1904 = vsyncpa [#allocation3 + $0x1], 1 }
 0xb19   :  { %1905 = vsyncpa [#allocation6], 1 }
 0xb1a   :  { %1907 = vsyncpa [#allocation6 + $0x1], 1 }
 0xb1b   :  { %1908 = vsyncpa [#allocation9], 1 }
 0xb1c   :  { %1909 = vsyncpa [#allocation4], 1 }
 0xb1d   :  { %1911 = vsyncpa [#allocation4 + $0x1], 1 }

</bundles_post_ra>
